<compile_context>
chip_gen: v7x
topology: tpu7x:2x2x1
jax: 0.10.0
libtpu: 0.0.40
codegen_flags: <defaults>
</compile_context>

<pallas_src>
import functools
import math

import jax
import jax.numpy as jnp
from jax.experimental import pallas as pl
from jax.experimental.pallas import tpu as pltpu

IN_FEATURES = 28 * 28          # 784
IN_PAD = 896                   # 7 * 128 (lane-aligned K)
HIDDEN = 512
OUT_FEATURES = 10
OUT_PAD = 128                  # lane-dense output
DROP_P = 0.2
_DROP_THRESHOLD = int(DROP_P * (1 << 32))   # keep iff hash_u32 >= threshold


def _round_up(x, m):
    return ((x + m - 1) // m) * m


def _mlp_kernel(seed_ref, x_ref, w1_ref, b1_ref, w2_ref, b2_ref, o_ref,
                *, apply_dropout: bool):
    # fc1 (MXU, f32 accumulation) + bias + ReLU in f32.
    h = jnp.dot(x_ref[...], w1_ref[...], preferred_element_type=jnp.float32)
    h = jnp.maximum(h + b1_ref[...], 0.0)

    if apply_dropout:
        # Inverted dropout with a counter-based hash (portable: no TPU-only PRNG prims).
        tb, hidden = h.shape
        tile = pl.program_id(0)
        rows = jax.lax.broadcasted_iota(jnp.int32, (tb, hidden), 0) + tile * tb
        cols = jax.lax.broadcasted_iota(jnp.int32, (tb, hidden), 1)
        ctr = (rows * hidden + cols).astype(jnp.uint32)      # global element counter
        s = seed_ref[0].astype(jnp.uint32) * jnp.uint32(0x9E3779B9)
        z = ctr ^ s
        z = z ^ (z >> 16)
        z = z * jnp.uint32(0x85EBCA6B)
        z = z ^ (z >> 13)
        z = z * jnp.uint32(0xC2B2AE35)
        z = z ^ (z >> 16)
        keep = z >= jnp.uint32(_DROP_THRESHOLD)
        h = jnp.where(keep, h * (1.0 / (1.0 - DROP_P)), 0.0)

    # fc2: cast activations to the operand dtype (bf16 on v6e/v7x) for the MXU.
    h = h.astype(w2_ref.dtype)
    out = jnp.dot(h, w2_ref[...], preferred_element_type=jnp.float32) + b2_ref[...]
    o_ref[...] = out.astype(o_ref.dtype)


def simple_dnn_forward(x, w1, b1, w2, b2, seed, *, dropout=True,
                       compute_dtype=jnp.float32, batch_tile=None):
    """x: (B, 784) or (B, 1, 28, 28) f32. Returns logits (B, 10) f32.

    w1: (784, 512), b1: (512,) or (1,512), w2: (512, 10), b2: (10,) or (1,10)
    (weights stored as (in, out); equivalent to PyTorch's x @ W.T + b).
    """
    x = x.reshape(-1, IN_FEATURES)
    B = x.shape[0]

    # Batch tile: multiple of 8 (sublane), capped at 256 (fills 256-wide MXU on v6e/v7x
    # while keeping the x tile well under the 32 MiB scoped-VMEM default on v7x).
    if batch_tile is None:
        batch_tile = 256 if B >= 256 else _round_up(B, 8)
    tb = batch_tile
    Bp = _round_up(B, tb)

    # Zero-pad to lane/tile-friendly shapes (padding contributes exact zeros).
    xp = jnp.pad(x.astype(compute_dtype), ((0, Bp - B), (0, IN_PAD - IN_FEATURES)))
    w1p = jnp.pad(w1.astype(compute_dtype), ((0, IN_PAD - IN_FEATURES), (0, 0)))
    w2p = jnp.pad(w2.astype(compute_dtype), ((0, 0), (0, OUT_PAD - OUT_FEATURES)))
    b1p = b1.reshape(1, HIDDEN).astype(jnp.float32)
    b2p = jnp.pad(b2.reshape(1, OUT_FEATURES).astype(jnp.float32),
                  ((0, 0), (0, OUT_PAD - OUT_FEATURES)))
    seed = jnp.asarray(seed, jnp.int32).reshape((1,))

    grid = (Bp // tb,)
    kernel = functools.partial(_mlp_kernel, apply_dropout=bool(dropout))

    grid_spec = pltpu.PrefetchScalarGridSpec(
        num_scalar_prefetch=1,       # seed -> SMEM
        grid=grid,
        in_specs=[
            pl.BlockSpec((tb, IN_PAD), lambda i, seed: (i, 0)),       # x: streamed per tile
            pl.BlockSpec((IN_PAD, HIDDEN), lambda i, seed: (0, 0)),   # w1: VMEM-resident
            pl.BlockSpec((1, HIDDEN), lambda i, seed: (0, 0)),        # b1
            pl.BlockSpec((HIDDEN, OUT_PAD), lambda i, seed: (0, 0)),  # w2
            pl.BlockSpec((1, OUT_PAD), lambda i, seed: (0, 0)),       # b2
        ],
        out_specs=pl.BlockSpec((tb, OUT_PAD), lambda i, seed: (i, 0)),
    )

    itemsize = jnp.dtype(compute_dtype).itemsize
    cost = pl.CostEstimate(
        flops=2 * Bp * IN_PAD * HIDDEN + 2 * Bp * HIDDEN * OUT_PAD,
        transcendentals=0,
        bytes_accessed=(Bp * IN_PAD * itemsize
                        + IN_PAD * HIDDEN * itemsize
                        + HIDDEN * OUT_PAD * itemsize
                        + (HIDDEN + OUT_PAD) * 4
                        + Bp * OUT_PAD * 4),
    )

    out = pl.pallas_call(
        kernel,
        out_shape=jax.ShapeDtypeStruct((Bp, OUT_PAD), jnp.float32),
        grid_spec=grid_spec,
        compiler_params=pltpu.CompilerParams(
            dimension_semantics=("parallel",)),   # megacore sharding on v7x
        cost_estimate=cost,
    )(seed, xp, w1p, b1p, w2p, b2p)

    return out[:B, :OUT_FEATURES]


def init_params(key):
    """Matches PyTorch nn.Linear default init: U(-1/sqrt(fan_in), 1/sqrt(fan_in))."""
    k1, k2, k3, k4 = jax.random.split(key, 4)
    bound1 = 1.0 / math.sqrt(IN_FEATURES)
    bound2 = 1.0 / math.sqrt(HIDDEN)
    w1 = jax.random.uniform(k1, (IN_FEATURES, HIDDEN), jnp.float32, -bound1, bound1)
    b1 = jax.random.uniform(k2, (HIDDEN,), jnp.float32, -bound1, bound1)
    w2 = jax.random.uniform(k3, (HIDDEN, OUT_FEATURES), jnp.float32, -bound2, bound2)
    b2 = jax.random.uniform(k4, (OUT_FEATURES,), jnp.float32, -bound2, bound2)
    return w1, b1, w2, b2


if __name__ == "__main__":
    key = jax.random.PRNGKey(0)
    kx, kp = jax.random.split(key)

    B = 8  # small demo batch
    # MNIST-like NCHW input, flattened as in the PyTorch forward.
    x_img = jax.random.normal(kx, (B, 1, 28, 28), jnp.float32)
    x = x_img.reshape(-1, IN_FEATURES)

    w1, b1, w2, b2 = init_params(kp)
    seed = jnp.array([42], dtype=jnp.int32)

    # Training-mode forward (dropout on).
    out_train = simple_dnn_forward(x_img, w1, b1, w2, b2, seed, dropout=True)
    out_train = jax.block_until_ready(out_train)
    assert out_train.shape == (B, OUT_FEATURES)
    assert bool(jnp.all(jnp.isfinite(out_train)))

    # Eval path (dropout off) vs pure-JAX reference, f32 operands.
    out_eval = simple_dnn_forward(x_img, w1, b1, w2, b2, seed, dropout=False)
    out_eval = jax.block_until_ready(out_eval)
    ref = jnp.maximum(x @ w1 + b1[None, :], 0.0) @ w2 + b2[None, :]
    assert jnp.allclose(out_eval, ref, atol=1e-4, rtol=1e-4)

    # bf16-operand path (recommended on v6e/v7x) — loose check against f32 reference.
    out_bf16 = simple_dnn_forward(x_img, w1, b1, w2, b2, seed, dropout=False,
                                  compute_dtype=jnp.bfloat16)
    out_bf16 = jax.block_until_ready(out_bf16)
    assert jnp.allclose(out_bf16, ref, atol=0.1, rtol=0.1)

    print("KERNEL_OK")
</pallas_src>

<mosaic_0001>
module attributes {stable_mosaic.version = 11 : i64} {
  func.func @_mlp_kernel(%arg0: i32, %arg1: memref<1xi32, #tpu.memory_space<smem>>, %arg2: memref<8x896xf32, #tpu.memory_space<vmem>>, %arg3: memref<896x512xf32, #tpu.memory_space<vmem>>, %arg4: memref<1x512xf32, #tpu.memory_space<vmem>>, %arg5: memref<512x128xf32, #tpu.memory_space<vmem>>, %arg6: memref<1x128xf32, #tpu.memory_space<vmem>>, %arg7: memref<8x128xf32, #tpu.memory_space<vmem>>) attributes {dimension_semantics = [#tpu.dimension_semantics<parallel>], iteration_bounds = array<i64: 1>, scalar_prefetch = 1 : i64, scratch_operands = 0 : i64, tpu.core_type = #tpu.core_type<tc>, window_params = [{transform_indices = @transform_0, window_bounds = array<i64: 8, 896>}, {pipeline_mode = #tpu.pipeline_mode<synchronous>, transform_indices = @transform_1, window_bounds = array<i64: 896, 512>}, {pipeline_mode = #tpu.pipeline_mode<synchronous>, transform_indices = @transform_2, window_bounds = array<i64: 1, 512>}, {pipeline_mode = #tpu.pipeline_mode<synchronous>, transform_indices = @transform_3, window_bounds = array<i64: 512, 128>}, {pipeline_mode = #tpu.pipeline_mode<synchronous>, transform_indices = @transform_4, window_bounds = array<i64: 1, 128>}, {transform_indices = @transform_5, window_bounds = array<i64: 8, 128>}]} {
    %c0 = arith.constant 0 : index
    %c0_0 = arith.constant 0 : index
    %0 = vector.load %arg2[%c0, %c0_0] : memref<8x896xf32, #tpu.memory_space<vmem>>, vector<8x896xf32>
    %c0_1 = arith.constant 0 : index
    %c0_2 = arith.constant 0 : index
    %1 = vector.load %arg3[%c0_1, %c0_2] : memref<896x512xf32, #tpu.memory_space<vmem>>, vector<896x512xf32>
    %cst = arith.constant dense<0.000000e+00> : vector<8x512xf32>
    %2 = tpu.matmul %0, %1, %cst {dimension_numbers = #tpu.dot_dimension_numbers<[1], [0], [0], [1], [0, 0, 1, 1], [], []>} : vector<8x896xf32>, vector<896x512xf32>, vector<8x512xf32> -> vector<8x512xf32>
    %c0_3 = arith.constant 0 : index
    %c0_4 = arith.constant 0 : index
    %3 = vector.load %arg4[%c0_3, %c0_4] : memref<1x512xf32, #tpu.memory_space<vmem>>, vector<1x512xf32>
    %4 = vector.broadcast %3 : vector<1x512xf32> to vector<8x512xf32>
    %5 = arith.addf %2, %4 : vector<8x512xf32>
    %cst_5 = arith.constant 0.000000e+00 : f32
    %6 = vector.broadcast %cst_5 : f32 to vector<8x512xf32>
    %7 = arith.maximumf %5, %6 : vector<8x512xf32>
    %8 = tpu.iota {dimensions = array<i32: 0>} : vector<8x512xi32>
    %c8_i32 = arith.constant 8 : i32
    %9 = arith.muli %arg0, %c8_i32 : i32
    %10 = vector.broadcast %9 : i32 to vector<8x512xi32>
    %11 = arith.addi %8, %10 : vector<8x512xi32>
    %12 = tpu.iota {dimensions = array<i32: 1>} : vector<8x512xi32>
    %c512_i32 = arith.constant 512 : i32
    %13 = vector.broadcast %c512_i32 : i32 to vector<8x512xi32>
    %14 = arith.muli %11, %13 : vector<8x512xi32>
    %15 = arith.addi %14, %12 : vector<8x512xi32>
    %c0_6 = arith.constant 0 : index
    %16 = memref.load %arg1[%c0_6] : memref<1xi32, #tpu.memory_space<smem>>
    %c-1640531527_i32 = arith.constant -1640531527 : i32
    %17 = arith.muli %16, %c-1640531527_i32 : i32
    %18 = vector.broadcast %17 : i32 to vector<8x512xi32>
    %19 = arith.xori %15, %18 : vector<8x512xi32>
    %c16_i32 = arith.constant 16 : i32
    %20 = vector.broadcast %c16_i32 : i32 to vector<8x512xi32>
    %21 = arith.shrui %19, %20 : vector<8x512xi32>
    %22 = arith.xori %19, %21 : vector<8x512xi32>
    %c-2048144789_i32 = arith.constant -2048144789 : i32
    %23 = vector.broadcast %c-2048144789_i32 : i32 to vector<8x512xi32>
    %24 = arith.muli %22, %23 : vector<8x512xi32>
    %c13_i32 = arith.constant 13 : i32
    %25 = vector.broadcast %c13_i32 : i32 to vector<8x512xi32>
    %26 = arith.shrui %24, %25 : vector<8x512xi32>
    %27 = arith.xori %24, %26 : vector<8x512xi32>
    %c-1028477387_i32 = arith.constant -1028477387 : i32
    %28 = vector.broadcast %c-1028477387_i32 : i32 to vector<8x512xi32>
    %29 = arith.muli %27, %28 : vector<8x512xi32>
    %c16_i32_7 = arith.constant 16 : i32
    %30 = vector.broadcast %c16_i32_7 : i32 to vector<8x512xi32>
    %31 = arith.shrui %29, %30 : vector<8x512xi32>
    %32 = arith.xori %29, %31 : vector<8x512xi32>
    %c858993459_i32 = arith.constant 858993459 : i32
    %33 = vector.broadcast %c858993459_i32 : i32 to vector<8x512xi32>
    %34 = arith.cmpi uge, %32, %33 : vector<8x512xi32>
    %cst_8 = arith.constant 1.250000e+00 : f32
    %35 = vector.broadcast %cst_8 : f32 to vector<8x512xf32>
    %36 = arith.mulf %7, %35 : vector<8x512xf32>
    %cst_9 = arith.constant 0.000000e+00 : f32
    %37 = vector.broadcast %cst_9 : f32 to vector<8x512xf32>
    %38 = arith.select %34, %36, %37 : vector<8x512xi1>, vector<8x512xf32>
    %c0_10 = arith.constant 0 : index
    %c0_11 = arith.constant 0 : index
    %39 = vector.load %arg5[%c0_10, %c0_11] : memref<512x128xf32, #tpu.memory_space<vmem>>, vector<512x128xf32>
    %cst_12 = arith.constant dense<0.000000e+00> : vector<8x128xf32>
    %40 = tpu.matmul %38, %39, %cst_12 {dimension_numbers = #tpu.dot_dimension_numbers<[1], [0], [0], [1], [0, 0, 1, 1], [], []>} : vector<8x512xf32>, vector<512x128xf32>, vector<8x128xf32> -> vector<8x128xf32>
    %c0_13 = arith.constant 0 : index
    %c0_14 = arith.constant 0 : index
    %41 = vector.load %arg6[%c0_13, %c0_14] : memref<1x128xf32, #tpu.memory_space<vmem>>, vector<1x128xf32>
    %42 = vector.broadcast %41 : vector<1x128xf32> to vector<8x128xf32>
    %43 = arith.addf %40, %42 : vector<8x128xf32>
    %c0_15 = arith.constant 0 : index
    %c0_16 = arith.constant 0 : index
    %44 = vector.load %arg7[%c0_15, %c0_16] : memref<8x128xf32, #tpu.memory_space<vmem>>, vector<8x128xf32>
    tpu.vector_store %arg7[%c0_15, %c0_16], %43 {strides = array<i32>} : memref<8x128xf32, #tpu.memory_space<vmem>>, vector<8x128xf32>,
    return
  }
  func.func @transform_0(%arg0: i32, %arg1: memref<1xi32, #tpu.memory_space<smem>>) -> (i32, i32) {
    %c0_i32 = arith.constant 0 : i32
    %c0_i32_0 = arith.constant 0 : i32
    return %arg0, %c0_i32 : i32, i32
  }
  func.func @transform_1(%arg0: i32, %arg1: memref<1xi32, #tpu.memory_space<smem>>) -> (i32, i32) {
    %c0_i32 = arith.constant 0 : i32
    %c0_i32_0 = arith.constant 0 : i32
    %c0_i32_1 = arith.constant 0 : i32
    return %c0_i32, %c0_i32_0 : i32, i32
  }
  func.func @transform_2(%arg0: i32, %arg1: memref<1xi32, #tpu.memory_space<smem>>) -> (i32, i32) {
    %c0_i32 = arith.constant 0 : i32
    %c0_i32_0 = arith.constant 0 : i32
    %c0_i32_1 = arith.constant 0 : i32
    return %c0_i32, %c0_i32_0 : i32, i32
  }
  func.func @transform_3(%arg0: i32, %arg1: memref<1xi32, #tpu.memory_space<smem>>) -> (i32, i32) {
    %c0_i32 = arith.constant 0 : i32
    %c0_i32_0 = arith.constant 0 : i32
    %c0_i32_1 = arith.constant 0 : i32
    return %c0_i32, %c0_i32_0 : i32, i32
  }
  func.func @transform_4(%arg0: i32, %arg1: memref<1xi32, #tpu.memory_space<smem>>) -> (i32, i32) {
    %c0_i32 = arith.constant 0 : i32
    %c0_i32_0 = arith.constant 0 : i32
    %c0_i32_1 = arith.constant 0 : i32
    return %c0_i32, %c0_i32_0 : i32, i32
  }
  func.func @transform_5(%arg0: i32, %arg1: memref<1xi32, #tpu.memory_space<smem>>) -> (i32, i32) {
    %c0_i32 = arith.constant 0 : i32
    %c0_i32_0 = arith.constant 0 : i32
    return %arg0, %c0_i32 : i32, i32
  }
}

</mosaic_0001>

<bundles_post_ra>
// kernel: tpu_custom_call.1
= control target key start
LH: loop header
LB: loop body
LE: loop exit
PB: predicated region body
PF: predicated region fallthrough
CT: control target
= control target key end

     0   :  { %12 = vsyncpa [#allocation5], 0  ;;  %s2304_s0 = inlined_call_operand.<no memory space> [shape: s32[1], index: 0, kind: input, shape index: {}]   ;;  %s2305_s1 = inlined_call_operand.hbm [shape: f32[8,896], index: 1, kind: input, shape index: {}]   ;;  %s2306_s2 = inlined_call_operand.hbm [shape: f32[896,512], index: 2, kind: input, shape index: {}]   ;;  %s2307_s3 = inlined_call_operand.hbm [shape: f32[1,512], index: 3, kind: input, shape index: {}]   ;;  %s2308_s4 = inlined_call_operand.hbm [shape: f32[512,128], index: 4, kind: input, shape index: {}]   ;;  %s2309_s5 = inlined_call_operand.hbm [shape: f32[1,128], index: 5, kind: input, shape index: {}]   ;;  %s2310_s6 = inlined_call_operand.hbm [shape: f32[8,128], index: 6, kind: output, shape index: {}]  }
   0x1   :  { %13 = vsyncpa [#allocation8], 0 }
   0x2   :  { %14 = vsyncpa [#allocation11], 0 }
   0x3   :  { %15 = vsyncpa [#allocation6], 0  ;;  %s2183_s21 = smov [#allocation7]   ;;  %s2043_s25 = scalar_lea.hbm %s2306_s2, 57344 }
   0x4   :  { %s31_s22 = sshll.u32 %s2183_s21, 4  ;;  %p2044_p0 = scmp.ne.s32.totalorder %s2306_s2, %s2043_s25  ;;  %s32_s22 = int_to_ptr.vmem [resolvable:$true] %s31_s22 }
   0x5   :  { %p2047_p1 = scmp.lt.u32.totalorder %s2043_s25, %s2306_s2 }
   0x7   :  { %p2049_p2 = pnand %p2047_p1, %p2044_p0 }
   0x9   :  { %2052 = shalt.err (!%p2049_p2)
}
   0xa   :  { %s2053_s30 = scalar_lea.vmem %s32_s22, 57344  ;;  %p2058_p4 = scmp.lt.s32.totalorder %s32_s22, %s32_s22 }
   0xb   :  { %p2054_p3 = scmp.ne.s32.totalorder %s32_s22, %s2053_s30  ;;  %p2059_p5 = scmp.lt.s32.totalorder %s2053_s30, %s2053_s30 }
   0xd   :  { %p2060_p6 = por %p2059_p5, %p2058_p4 }
   0xf   :  { %p2061_p7 = pnand %p2060_p6, %p2054_p3 }
  0x11   :  { %2064 = shalt.err (!%p2061_p7)
}
  0x12   :  { %s2184_s7 = smov 512   ;;  %s2185_s8 = smov 32  }
  0x13   :  { %37 = dma.hbm_to_vmem [thread:$0]  %s2306_s2, 57344, %s32_s22, [#allocation8], %s2184_s7, %s2184_s7, %s2185_s8  }
  0x14   :  { %s2186_s11 = smov [#allocation10]   ;;  %s2065_s15 = scalar_lea.hbm %s2308_s4, 8192 }
  0x15   :  { %s53_s12 = sshll.u32 %s2186_s11, 4  ;;  %p2066_p8 = scmp.ne.s32.totalorder %s2308_s4, %s2065_s15  ;;  %s54_s12 = int_to_ptr.vmem [resolvable:$true] %s53_s12 }
  0x16   :  { %p2069_p9 = scmp.lt.u32.totalorder %s2065_s15, %s2308_s4 }
  0x18   :  { %p2071_p10 = pnand %p2069_p9, %p2066_p8 }
  0x1a   :  { %2074 = shalt.err (!%p2071_p10)
}
  0x1b   :  { %s2075_s20 = scalar_lea.vmem %s54_s12, 8192  ;;  %p2080_p12 = scmp.lt.s32.totalorder %s54_s12, %s54_s12 }
  0x1c   :  { %p2076_p11 = scmp.ne.s32.totalorder %s54_s12, %s2075_s20  ;;  %p2081_p13 = scmp.lt.s32.totalorder %s2075_s20, %s2075_s20 }
  0x1e   :  { %p2082_p0 = por %p2081_p13, %p2080_p12 }
  0x20   :  { %p2083_p1 = pnand %p2082_p0, %p2076_p11 }
  0x22   :  { %2086 = shalt.err (!%p2083_p1)
}
  0x23   :  { %s2187_s2 = smov 128   ;;  %s2188_s21 = smov 8  }
  0x24   :  { %59 = dma.hbm_to_vmem [thread:$0]  %s2308_s4, 8192, %s54_s12, [#allocation11], %s2187_s2, %s2187_s2, %s2188_s21  }
  0x25   :  { %s2189_s24 = smov [#allocation4]   ;;  %s2190_s26 = smov [#allocation9]  }
  0x26   :  { %s22_s25 = sshll.u32 %s2189_s24, 4  ;;  %s44_s27 = sshll.u32 %s2190_s26, 4  ;;  %s23_s25 = int_to_ptr.vmem [resolvable:$true] %s22_s25  ;;  %s45_s27 = int_to_ptr.vmem [resolvable:$true] %s44_s27 }
  0x27   :  { %s2087_s30 = scalar_lea.hbm %s2305_s1, 896 }
  0x28   :  { %p2088_p2 = scmp.ne.s32.totalorder %s2305_s1, %s2087_s30  ;;  %p2091_p3 = scmp.lt.u32.totalorder %s2087_s30, %s2305_s1 }
  0x2a   :  { %p2093_p4 = pnand %p2091_p3, %p2088_p2 }
  0x2c   :  { %2096 = shalt.err (!%p2093_p4)
}
  0x2d   :  { %s2097_s4 = scalar_lea.vmem %s23_s25, 896  ;;  %p2102_p6 = scmp.lt.s32.totalorder %s23_s25, %s23_s25 }
  0x2e   :  { %p2098_p5 = scmp.ne.s32.totalorder %s23_s25, %s2097_s4  ;;  %p2103_p7 = scmp.lt.s32.totalorder %s2097_s4, %s2097_s4 }
  0x30   :  { %p2104_p8 = por %p2103_p7, %p2102_p6 }
  0x32   :  { %p2105_p9 = pnand %p2104_p8, %p2098_p5 }
  0x34   :  { %2108 = shalt.err (!%p2105_p9)
}
  0x35   :  { %25 = dma.hbm_to_vmem [thread:$0]  %s2305_s1, 896, %s23_s25, [#allocation5]  }
  0x36   :  { %s2109_s15 = scalar_lea.hbm %s2307_s3, 64 }
  0x37   :  { %p2110_p10 = scmp.ne.s32.totalorder %s2307_s3, %s2109_s15  ;;  %p2113_p11 = scmp.lt.u32.totalorder %s2109_s15, %s2307_s3 }
  0x39   :  { %p2115_p12 = pnand %p2113_p11, %p2110_p10 }
  0x3b   :  { %2118 = shalt.err (!%p2115_p12)
}
  0x3c   :  { %s2119_s20 = scalar_lea.vmem %s45_s27, 64  ;;  %p2124_p0 = scmp.lt.s32.totalorder %s45_s27, %s45_s27 }
  0x3d   :  { %p2120_p13 = scmp.ne.s32.totalorder %s45_s27, %s2119_s20  ;;  %p2125_p1 = scmp.lt.s32.totalorder %s2119_s20, %s2119_s20 }
  0x3f   :  { %p2126_p2 = por %p2125_p1, %p2124_p0 }
  0x41   :  { %p2127_p3 = pnand %p2126_p2, %p2120_p13 }
  0x43   :  { %2130 = shalt.err (!%p2127_p3)
}
  0x44   :  { %47 = dma.hbm_to_vmem [thread:$0]  %s2307_s3, 64, %s45_s27, [#allocation8]  }
  0x45   :  { %s2191_s21 = smov [#allocation12]   ;;  %s2131_s25 = scalar_lea.hbm %s2309_s5, 16 }
  0x46   :  { %s66_s22 = sshll.u32 %s2191_s21, 4  ;;  %p2132_p4 = scmp.ne.s32.totalorder %s2309_s5, %s2131_s25  ;;  %s67_s22 = int_to_ptr.vmem [resolvable:$true] %s66_s22 }
  0x47   :  { %p2135_p5 = scmp.lt.u32.totalorder %s2131_s25, %s2309_s5 }
  0x49   :  { %p2137_p6 = pnand %p2135_p5, %p2132_p4 }
  0x4b   :  { %2140 = shalt.err (!%p2137_p6)
}
  0x4c   :  { %s2141_s7 = scalar_lea.vmem %s67_s22, 16  ;;  %s2145_s3 = scalar_lea.vmem %s67_s22, 32 }
  0x4d   :  { %p2142_p7 = scmp.ne.s32.totalorder %s67_s22, %s2141_s7  ;;  %p2146_p8 = scmp.lt.s32.totalorder %s67_s22, %s67_s22 }
  0x4e   :  { %p2147_p9 = scmp.lt.s32.totalorder %s2145_s3, %s2141_s7 }
  0x50   :  { %p2148_p10 = por %p2147_p9, %p2146_p8 }
  0x52   :  { %p2149_p11 = pnand %p2148_p10, %p2142_p7 }
  0x54   :  { %2152 = shalt.err (!%p2149_p11)
}
  0x55   :  { %69 = dma.hbm_to_vmem [thread:$0]  %s2309_s5, 16, %s67_s22, [#allocation11]  }
  0x56   :  { %2175 = dma.done.wait [#allocation5], 896  }
  0x57   :  { %2176 = vsyncadd [#allocation5], 4294966400 }
  0x58   :  { %2177 = dma.done.wait [#allocation8], 57408  }
  0x59   :  { %2178 = vsyncadd [#allocation8], 4294909888 }
  0x5a   :  { %2179 = dma.done.wait [#allocation11], 8208  }
  0x5b   :  { %2180 = vsyncadd [#allocation11], 4294959088  ;;  %v93_v0 = vld [vmem:[#allocation7 + $0x8] sm:$0xff]  ;;  %v95_v2 = vld [vmem:[#allocation7 + $0x18] sm:$0xff]  ;;  %s1150_s10 = smul.u32 2654435769, %s2304_s0 }
  0x5c   :  { %v97_v1 = vld [vmem:[#allocation7 + $0x28] sm:$0xff]  ;;  %v99_v4 = vld [vmem:[#allocation7 + $0x38] sm:$0xff]  ;;  %v92_v5 = vld [vmem:[#allocation7] sm:$0xff]  ;;  %s2193_s0 = smov [#allocation13]  }
  0x5d   :  { %v1504_v3 = vpack.c.bf16 %v97_v1, %v93_v0  ;;  %v96_v6 = vld [vmem:[#allocation7 + $0x20] sm:$0xff]  ;;  %v1728_v7 = vpack.c.bf16 %v99_v4, %v95_v2  ;;  %v94_v9 = vld [vmem:[#allocation7 + $0x10] sm:$0xff]  ;;  %v101_v11 = vld [vmem:[#allocation7 + $0x48] sm:$0xff]  ;;  %s1418_s4 = sshll.u32 %s2193_s0, 4  ;;  %s1419_s4 = int_to_ptr.vmem [resolvable:$true] %s1418_s4 }
  0x5e   :  { %v1506_v8 = vpack.c.bf16 %v96_v6, %v92_v5  ;;  %v98_v10 = vld [vmem:[#allocation7 + $0x30] sm:$0xff]  ;;  %v105_v13 = vld [vmem:[#allocation7 + $0x68] sm:$0xff]  ;;  %v103_v14 = vld [vmem:[#allocation7 + $0x58] sm:$0xff]  ;;  %s2153_s11 = scalar_lea.vmem %s1419_s4, 128  ;;  %p2158_p13 = scmp.lt.s32.totalorder %s1419_s4, %s1419_s4 }
  0x5f   :  { %1505 = vmatprep.subr.bf16.mxu0 %v1504_v3  ;;  %v1730_v12 = vpack.c.bf16 %v98_v10, %v94_v9  ;;  %v107_v15 = vld [vmem:[#allocation7 + $0x78] sm:$0xff]  ;;  %1729 = vmatprep.subr.bf16.mxu1 %v1728_v7  ;;  %v1508_v16 = vpack.c.bf16 %v105_v13, %v101_v11  ;;  %v100_v18 = vld [vmem:[#allocation7 + $0x40] sm:$0xff]  ;;  %v102_v20 = vld [vmem:[#allocation7 + $0x50] sm:$0xff]  ;;  %p2154_p12 = scmp.ne.s32.totalorder %s1419_s4, %s2153_s11  ;;  %p2159_p0 = scmp.lt.s32.totalorder %s2153_s11, %s2153_s11 }
  0x60   :  { %1507 = vmatpush1.bf16.msra.mxu0 %v1506_v8  ;;  %v1732_v17 = vpack.c.bf16 %v107_v15, %v103_v14  ;;  %v104_v19 = vld [vmem:[#allocation7 + $0x60] sm:$0xff]  ;;  %v106_v22 = vld [vmem:[#allocation7 + $0x70] sm:$0xff]  ;;  %v109_v23 = vld [vmem:[#allocation7 + $0x88] sm:$0xff] }
  0x61   :  { %1731 = vmatpush1.bf16.msra.mxu1 %v1730_v12  ;;  %v1510_v21 = vpack.c.bf16 %v104_v19, %v100_v18  ;;  %v113_v24 = vld [vmem:[#allocation7 + $0xa8] sm:$0xff]  ;;  %1509 = vmatprep.subr.bf16.mxu0 %v1508_v16  ;;  %v1734_v25 = vpack.c.bf16 %v106_v22, %v102_v20  ;;  %v111_v27 = vld [vmem:[#allocation7 + $0x98] sm:$0xff]  ;;  %v108_v29 = vld [vmem:[#allocation7 + $0x80] sm:$0xff]  ;;  %p2160_p1 = por %p2159_p0, %p2158_p13 }
  0x62   :  { %1733 = vmatprep.subr.bf16.mxu1 %v1732_v17  ;;  %v1512_v26 = vpack.c.bf16 %v113_v24, %v109_v23  ;;  %v115_v28 = vld [vmem:[#allocation7 + $0xb8] sm:$0xff]  ;;  %v112_v31 = vld [vmem:[#allocation7 + $0xa0] sm:$0xff]  ;;  %v110_v32 = vld [vmem:[#allocation7 + $0x90] sm:$0xff] }
  0x63   :  { %v1736_v30 = vpack.c.bf16 %v115_v28, %v111_v27  ;;  %v114_v33 = vld [vmem:[#allocation7 + $0xb0] sm:$0xff]  ;;  %v1514_v34 = vpack.c.bf16 %v112_v31, %v108_v29  ;;  %v117_v35 = vld [vmem:[#allocation7 + $0xc8] sm:$0xff]  ;;  %v119_v37 = vld [vmem:[#allocation7 + $0xd8] sm:$0xff]  ;;  %p2161_p2 = pnand %p2160_p1, %p2154_p12 }
  0x64   :  { %1511 = vmatpush1.bf16.msra.mxu0 %v1510_v21  ;;  %v121_v36 = vld [vmem:[#allocation7 + $0xe8] sm:$0xff]  ;;  %v1738_v38 = vpack.c.bf16 %v114_v33, %v110_v32  ;;  %v123_v40 = vld [vmem:[#allocation7 + $0xf8] sm:$0xff]  ;;  %v116_v41 = vld [vmem:[#allocation7 + $0xc0] sm:$0xff] }
  0x65   :  { %1735 = vmatpush1.bf16.msra.mxu1 %v1734_v25  ;;  %1513 = vmatprep.subr.bf16.mxu0 %v1512_v26  ;;  %v1516_v39 = vpack.c.bf16 %v121_v36, %v117_v35  ;;  %v120_v42 = vld [vmem:[#allocation7 + $0xe0] sm:$0xff]  ;;  %v1740_v43 = vpack.c.bf16 %v123_v40, %v119_v37  ;;  %v118_v44 = vld [vmem:[#allocation7 + $0xd0] sm:$0xff]  ;;  %v125_v46 = vld [vmem:[#allocation7 + $0x108] sm:$0xff] }
  0x66   :  { %1737 = vmatprep.subr.bf16.mxu1 %v1736_v30  ;;  %v122_v45 = vld [vmem:[#allocation7 + $0xf0] sm:$0xff]  ;;  %v129_v47 = vld [vmem:[#allocation7 + $0x128] sm:$0xff]  ;;  %v127_v48 = vld [vmem:[#allocation7 + $0x118] sm:$0xff]  ;;  %v1518_v50 = vpack.c.bf16 %v120_v42, %v116_v41 }
  0x67   :  { %v131_v49 = vld [vmem:[#allocation7 + $0x138] sm:$0xff]  ;;  %v1742_v51 = vpack.c.bf16 %v122_v45, %v118_v44  ;;  %v1520_v52 = vpack.c.bf16 %v129_v47, %v125_v46  ;;  %v124_v53 = vld [vmem:[#allocation7 + $0x100] sm:$0xff]  ;;  %v126_v55 = vld [vmem:[#allocation7 + $0x110] sm:$0xff] }
  0x68   :  { %1515 = vmatpush1.bf16.msra.mxu0 %v1514_v34  ;;  %v128_v54 = vld [vmem:[#allocation7 + $0x120] sm:$0xff]  ;;  %v1744_v56 = vpack.c.bf16 %v131_v49, %v127_v48  ;;  %v130_v57 = vld [vmem:[#allocation7 + $0x130] sm:$0xff]  ;;  %v133_v58 = vld [vmem:[#allocation7 + $0x148] sm:$0xff] }
  0x69   :  { %1739 = vmatpush1.bf16.msra.mxu1 %v1738_v38  ;;  %1517 = vmatprep.subr.bf16.mxu0 %v1516_v39  ;;  %v137_v59 = vld [vmem:[#allocation7 + $0x168] sm:$0xff]  ;;  %v135_v60 = vld [vmem:[#allocation7 + $0x158] sm:$0xff]  ;;  %v1522_v62 = vpack.c.bf16 %v128_v54, %v124_v53  ;;  %v1746_v63 = vpack.c.bf16 %v130_v57, %v126_v55  ;;  %v132_v1 = vld [vmem:[#allocation7 + $0x140] sm:$0xff] }
  0x6a   :  { %1741 = vmatprep.subr.bf16.mxu1 %v1740_v43  ;;  %v139_v61 = vld [vmem:[#allocation7 + $0x178] sm:$0xff]  ;;  %v1524_v0 = vpack.c.bf16 %v137_v59, %v133_v58  ;;  %v136_v2 = vld [vmem:[#allocation7 + $0x160] sm:$0xff]  ;;  %v134_v3 = vld [vmem:[#allocation7 + $0x150] sm:$0xff] }
  0x6b   :  { %v1748_v4 = vpack.c.bf16 %v139_v61, %v135_v60  ;;  %v138_v5 = vld [vmem:[#allocation7 + $0x170] sm:$0xff]  ;;  %v141_v6 = vld [vmem:[#allocation7 + $0x188] sm:$0xff]  ;;  %v143_v8 = vld [vmem:[#allocation7 + $0x198] sm:$0xff]  ;;  %v1526_v10 = vpack.c.bf16 %v136_v2, %v132_v1 }
  0x6c   :  { %1519 = vmatpush1.bf16.msra.mxu0 %v1518_v50  ;;  %v145_v7 = vld [vmem:[#allocation7 + $0x1a8] sm:$0xff]  ;;  %v147_v9 = vld [vmem:[#allocation7 + $0x1b8] sm:$0xff]  ;;  %v1750_v11 = vpack.c.bf16 %v138_v5, %v134_v3  ;;  %v140_v13 = vld [vmem:[#allocation7 + $0x180] sm:$0xff] }
  0x6d   :  { %1743 = vmatpush1.bf16.msra.mxu1 %v1742_v51  ;;  %1521 = vmatprep.subr.bf16.mxu0 %v1520_v52  ;;  %v1528_v12 = vpack.c.bf16 %v145_v7, %v141_v6  ;;  %v144_v14 = vld [vmem:[#allocation7 + $0x1a0] sm:$0xff]  ;;  %v142_v15 = vld [vmem:[#allocation7 + $0x190] sm:$0xff]  ;;  %v1752_v16 = vpack.c.bf16 %v147_v9, %v143_v8  ;;  %v149_v18 = vld [vmem:[#allocation7 + $0x1c8] sm:$0xff] }
  0x6e   :  { %1745 = vmatprep.subr.bf16.mxu1 %v1744_v56  ;;  %v146_v17 = vld [vmem:[#allocation7 + $0x1b0] sm:$0xff]  ;;  %v153_v19 = vld [vmem:[#allocation7 + $0x1e8] sm:$0xff]  ;;  %v151_v20 = vld [vmem:[#allocation7 + $0x1d8] sm:$0xff]  ;;  %v1530_v22 = vpack.c.bf16 %v144_v14, %v140_v13 }
  0x6f   :  { %v155_v21 = vld [vmem:[#allocation7 + $0x1f8] sm:$0xff]  ;;  %v1754_v23 = vpack.c.bf16 %v146_v17, %v142_v15  ;;  %v1532_v24 = vpack.c.bf16 %v153_v19, %v149_v18  ;;  %v148_v25 = vld [vmem:[#allocation7 + $0x1c0] sm:$0xff]  ;;  %v150_v27 = vld [vmem:[#allocation7 + $0x1d0] sm:$0xff] }
  0x70   :  { %1523 = vmatpush1.bf16.msra.mxu0 %v1522_v62  ;;  %v152_v26 = vld [vmem:[#allocation7 + $0x1e0] sm:$0xff]  ;;  %v1756_v28 = vpack.c.bf16 %v155_v21, %v151_v20  ;;  %v154_v29 = vld [vmem:[#allocation7 + $0x1f0] sm:$0xff]  ;;  %v157_v30 = vld [vmem:[#allocation7 + $0x208] sm:$0xff] }
  0x71   :  { %1747 = vmatpush1.bf16.msra.mxu1 %v1746_v63  ;;  %1525 = vmatprep.subr.bf16.mxu0 %v1524_v0  ;;  %v161_v31 = vld [vmem:[#allocation7 + $0x228] sm:$0xff]  ;;  %v159_v32 = vld [vmem:[#allocation7 + $0x218] sm:$0xff]  ;;  %v1534_v34 = vpack.c.bf16 %v152_v26, %v148_v25  ;;  %v1758_v35 = vpack.c.bf16 %v154_v29, %v150_v27  ;;  %v156_v37 = vld [vmem:[#allocation7 + $0x200] sm:$0xff] }
  0x72   :  { %1749 = vmatprep.subr.bf16.mxu1 %v1748_v4  ;;  %v163_v33 = vld [vmem:[#allocation7 + $0x238] sm:$0xff]  ;;  %v1536_v36 = vpack.c.bf16 %v161_v31, %v157_v30  ;;  %v160_v38 = vld [vmem:[#allocation7 + $0x220] sm:$0xff]  ;;  %v158_v39 = vld [vmem:[#allocation7 + $0x210] sm:$0xff] }
  0x73   :  { %v1760_v40 = vpack.c.bf16 %v163_v33, %v159_v32  ;;  %v162_v41 = vld [vmem:[#allocation7 + $0x230] sm:$0xff]  ;;  %v165_v42 = vld [vmem:[#allocation7 + $0x248] sm:$0xff]  ;;  %v167_v44 = vld [vmem:[#allocation7 + $0x258] sm:$0xff]  ;;  %v1538_v46 = vpack.c.bf16 %v160_v38, %v156_v37 }
  0x74   :  { %1527 = vmatpush1.bf16.msra.mxu0 %v1526_v10  ;;  %v169_v43 = vld [vmem:[#allocation7 + $0x268] sm:$0xff]  ;;  %v171_v45 = vld [vmem:[#allocation7 + $0x278] sm:$0xff]  ;;  %v1762_v47 = vpack.c.bf16 %v162_v41, %v158_v39  ;;  %v164_v49 = vld [vmem:[#allocation7 + $0x240] sm:$0xff] }
  0x75   :  { %1751 = vmatpush1.bf16.msra.mxu1 %v1750_v11  ;;  %1529 = vmatprep.subr.bf16.mxu0 %v1528_v12  ;;  %v1540_v48 = vpack.c.bf16 %v169_v43, %v165_v42  ;;  %v168_v50 = vld [vmem:[#allocation7 + $0x260] sm:$0xff]  ;;  %v166_v51 = vld [vmem:[#allocation7 + $0x250] sm:$0xff]  ;;  %v1764_v52 = vpack.c.bf16 %v171_v45, %v167_v44  ;;  %v173_v54 = vld [vmem:[#allocation7 + $0x288] sm:$0xff] }
  0x76   :  { %1753 = vmatprep.subr.bf16.mxu1 %v1752_v16  ;;  %v170_v53 = vld [vmem:[#allocation7 + $0x270] sm:$0xff]  ;;  %v177_v55 = vld [vmem:[#allocation7 + $0x2a8] sm:$0xff]  ;;  %v175_v56 = vld [vmem:[#allocation7 + $0x298] sm:$0xff]  ;;  %v1542_v58 = vpack.c.bf16 %v168_v50, %v164_v49 }
  0x77   :  { %v179_v57 = vld [vmem:[#allocation7 + $0x2b8] sm:$0xff]  ;;  %v1766_v59 = vpack.c.bf16 %v170_v53, %v166_v51  ;;  %v1544_v60 = vpack.c.bf16 %v177_v55, %v173_v54  ;;  %v172_v61 = vld [vmem:[#allocation7 + $0x280] sm:$0xff]  ;;  %v174_v63 = vld [vmem:[#allocation7 + $0x290] sm:$0xff] }
  0x78   :  { %1531 = vmatpush1.bf16.msra.mxu0 %v1530_v22  ;;  %v176_v62 = vld [vmem:[#allocation7 + $0x2a0] sm:$0xff]  ;;  %v1768_v0 = vpack.c.bf16 %v179_v57, %v175_v56  ;;  %v178_v1 = vld [vmem:[#allocation7 + $0x2b0] sm:$0xff]  ;;  %v181_v2 = vld [vmem:[#allocation7 + $0x2c8] sm:$0xff] }
  0x79   :  { %1755 = vmatpush1.bf16.msra.mxu1 %v1754_v23  ;;  %1533 = vmatprep.subr.bf16.mxu0 %v1532_v24  ;;  %v185_v3 = vld [vmem:[#allocation7 + $0x2e8] sm:$0xff]  ;;  %v183_v4 = vld [vmem:[#allocation7 + $0x2d8] sm:$0xff]  ;;  %v1546_v6 = vpack.c.bf16 %v176_v62, %v172_v61  ;;  %v180_v7 = vld [vmem:[#allocation7 + $0x2c0] sm:$0xff]  ;;  %v1770_v8 = vpack.c.bf16 %v178_v1, %v174_v63 }
  0x7a   :  { %1757 = vmatprep.subr.bf16.mxu1 %v1756_v28  ;;  %v187_v5 = vld [vmem:[#allocation7 + $0x2f8] sm:$0xff]  ;;  %v1548_v9 = vpack.c.bf16 %v185_v3, %v181_v2  ;;  %v184_v10 = vld [vmem:[#allocation7 + $0x2e0] sm:$0xff]  ;;  %v182_v11 = vld [vmem:[#allocation7 + $0x2d0] sm:$0xff] }
  0x7b   :  { %v186_v12 = vld [vmem:[#allocation7 + $0x2f0] sm:$0xff]  ;;  %v1772_v13 = vpack.c.bf16 %v187_v5, %v183_v4  ;;  %v189_v14 = vld [vmem:[#allocation7 + $0x308] sm:$0xff]  ;;  %v191_v17 = vld [vmem:[#allocation7 + $0x318] sm:$0xff]  ;;  %v1550_v19 = vpack.c.bf16 %v184_v10, %v180_v7 }
  0x7c   :  { %1535 = vmatpush1.bf16.msra.mxu0 %v1534_v34  ;;  %v193_v15 = vld [vmem:[#allocation7 + $0x328] sm:$0xff]  ;;  %v86_v16 = vld [vmem:[#allocation4 + $0x8] sm:$0xff]  ;;  %v195_v18 = vld [vmem:[#allocation7 + $0x338] sm:$0xff]  ;;  %v1774_v20 = vpack.c.bf16 %v186_v12, %v182_v11 }
  0x7d   :  { %1759 = vmatpush1.bf16.msra.mxu1 %v1758_v35  ;;  %1537 = vmatprep.subr.bf16.mxu0 %v1536_v36  ;;  %v1552_v21 = vpack.c.bf16 %v193_v15, %v189_v14  ;;  %v188_v22 = vld [vmem:[#allocation7 + $0x300] sm:$0xff]  ;;  %v190_v24 = vld [vmem:[#allocation7 + $0x310] sm:$0xff]  ;;  %v1776_v25 = vpack.c.bf16 %v195_v18, %v191_v17  ;;  %v197_v27 = vld [vmem:[#allocation7 + $0x348] sm:$0xff] }
  0x7e   :  { %1761 = vmatprep.subr.bf16.mxu1 %v1760_v40  ;;  %626 = vmatprep.mubr.f32.mxu0 %v86_v16  ;;  %v192_v23 = vld [vmem:[#allocation7 + $0x320] sm:$0xff]  ;;  %v194_v26 = vld [vmem:[#allocation7 + $0x330] sm:$0xff]  ;;  %v201_v28 = vld [vmem:[#allocation7 + $0x368] sm:$0xff] }
  0x7f   :  { %910 = vmatprep.mubr.f32.mxu1 %v86_v16  ;;  %v199_v29 = vld [vmem:[#allocation7 + $0x358] sm:$0xff]  ;;  %v1554_v31 = vpack.c.bf16 %v192_v23, %v188_v22  ;;  %v1778_v32 = vpack.c.bf16 %v194_v26, %v190_v24  ;;  %v1556_v33 = vpack.c.bf16 %v201_v28, %v197_v27  ;;  %v196_v34 = vld [vmem:[#allocation7 + $0x340] sm:$0xff]  ;;  %v198_v36 = vld [vmem:[#allocation7 + $0x350] sm:$0xff] }
  0x80   :  { %1539 = vmatpush1.bf16.msra.mxu0 %v1538_v46  ;;  %v203_v30 = vld [vmem:[#allocation7 + $0x378] sm:$0xff]  ;;  %v200_v35 = vld [vmem:[#allocation7 + $0x360] sm:$0xff]  ;;  %v202_v38 = vld [vmem:[#allocation7 + $0x370] sm:$0xff] }
  0x81   :  { %1763 = vmatpush1.bf16.msra.mxu1 %v1762_v47  ;;  %1541 = vmatprep.subr.bf16.mxu0 %v1540_v48  ;;  %v1780_v37 = vpack.c.bf16 %v203_v30, %v199_v29  ;;  %v205_v39 = vld [vmem:[#allocation7 + $0x388] sm:$0xff]  ;;  %v207_v41 = vld [vmem:[#allocation7 + $0x398] sm:$0xff]  ;;  %v1558_v43 = vpack.c.bf16 %v200_v35, %v196_v34  ;;  %v1782_v44 = vpack.c.bf16 %v202_v38, %v198_v36  ;;  %v204_v46 = vld [vmem:[#allocation7 + $0x380] sm:$0xff] }
  0x82   :  { %1765 = vmatprep.subr.bf16.mxu1 %v1764_v52  ;;  %v209_v40 = vld [vmem:[#allocation7 + $0x3a8] sm:$0xff]  ;;  %v211_v42 = vld [vmem:[#allocation7 + $0x3b8] sm:$0xff]  ;;  %v208_v47 = vld [vmem:[#allocation7 + $0x3a0] sm:$0xff] }
  0x83   :  { %v1560_v45 = vpack.c.bf16 %v209_v40, %v205_v39  ;;  %v206_v48 = vld [vmem:[#allocation7 + $0x390] sm:$0xff]  ;;  %v1784_v49 = vpack.c.bf16 %v211_v42, %v207_v41  ;;  %v213_v51 = vld [vmem:[#allocation7 + $0x3c8] sm:$0xff]  ;;  %v215_v53 = vld [vmem:[#allocation7 + $0x3d8] sm:$0xff]  ;;  %v1562_v55 = vpack.c.bf16 %v208_v47, %v204_v46 }
  0x84   :  { %1543 = vmatpush1.bf16.msra.mxu0 %v1542_v58  ;;  %v210_v50 = vld [vmem:[#allocation7 + $0x3b0] sm:$0xff]  ;;  %v217_v52 = vld [vmem:[#allocation7 + $0x3e8] sm:$0xff]  ;;  %v219_v54 = vld [vmem:[#allocation7 + $0x3f8] sm:$0xff] }
  0x85   :  { %1767 = vmatpush1.bf16.msra.mxu1 %v1766_v59  ;;  %1545 = vmatprep.subr.bf16.mxu0 %v1544_v60  ;;  %v1786_v56 = vpack.c.bf16 %v210_v50, %v206_v48  ;;  %v1564_v57 = vpack.c.bf16 %v217_v52, %v213_v51  ;;  %v212_v58 = vld [vmem:[#allocation7 + $0x3c0] sm:$0xff]  ;;  %v214_v60 = vld [vmem:[#allocation7 + $0x3d0] sm:$0xff]  ;;  %v1788_v61 = vpack.c.bf16 %v219_v54, %v215_v53  ;;  %v221_v63 = vld [vmem:[#allocation7 + $0x408] sm:$0xff] }
  0x86   :  { %1769 = vmatprep.subr.bf16.mxu1 %v1768_v0  ;;  %v216_v59 = vld [vmem:[#allocation7 + $0x3e0] sm:$0xff]  ;;  %v218_v62 = vld [vmem:[#allocation7 + $0x3f0] sm:$0xff]  ;;  %v225_v0 = vld [vmem:[#allocation7 + $0x428] sm:$0xff] }
  0x87   :  { %v223_v1 = vld [vmem:[#allocation7 + $0x418] sm:$0xff]  ;;  %v1566_v3 = vpack.c.bf16 %v216_v59, %v212_v58  ;;  %v1790_v4 = vpack.c.bf16 %v218_v62, %v214_v60  ;;  %v1568_v5 = vpack.c.bf16 %v225_v0, %v221_v63  ;;  %v224_v7 = vld [vmem:[#allocation7 + $0x420] sm:$0xff]  ;;  %v226_v10 = vld [vmem:[#allocation7 + $0x430] sm:$0xff] }
  0x88   :  { %1547 = vmatpush1.bf16.msra.mxu0 %v1546_v6  ;;  %v227_v2 = vld [vmem:[#allocation7 + $0x438] sm:$0xff]  ;;  %v220_v6 = vld [vmem:[#allocation7 + $0x400] sm:$0xff]  ;;  %v229_v11 = vld [vmem:[#allocation7 + $0x448] sm:$0xff] }
  0x89   :  { %1771 = vmatpush1.bf16.msra.mxu1 %v1770_v8  ;;  %1549 = vmatprep.subr.bf16.mxu0 %v1548_v9  ;;  %v222_v8 = vld [vmem:[#allocation7 + $0x410] sm:$0xff]  ;;  %v1792_v9 = vpack.c.bf16 %v227_v2, %v223_v1  ;;  %v233_v12 = vld [vmem:[#allocation7 + $0x468] sm:$0xff]  ;;  %v235_v14 = vld [vmem:[#allocation7 + $0x478] sm:$0xff]  ;;  %v1570_v16 = vpack.c.bf16 %v224_v7, %v220_v6 }
  0x8a   :  { %1773 = vmatprep.subr.bf16.mxu1 %v1772_v13  ;;  %v231_v13 = vld [vmem:[#allocation7 + $0x458] sm:$0xff]  ;;  %v85_v15 = vld [vmem:[#allocation4] sm:$0xff]  ;;  %v1794_v17 = vpack.c.bf16 %v226_v10, %v222_v8  ;;  %v1572_v18 = vpack.c.bf16 %v233_v12, %v229_v11  ;;  %v234_v23 = vld [vmem:[#allocation7 + $0x470] sm:$0xff] }
  0x8b   :  { %v1796_v22 = vpack.c.bf16 %v235_v14, %v231_v13  ;;  %v237_v24 = vld [vmem:[#allocation7 + $0x488] sm:$0xff]  ;;  %v239_v26 = vld [vmem:[#allocation7 + $0x498] sm:$0xff]  ;;  %v242_v35 = vld [vmem:[#allocation7 + $0x4b0] sm:$0xff] }
  0x8c   :  { %1551 = vmatpush1.bf16.msra.mxu0 %v1550_v19  ;;  %v228_v19 = vld [vmem:[#allocation7 + $0x440] sm:$0xff]  ;;  %v243_v27 = vld [vmem:[#allocation7 + $0x4b8] sm:$0xff]  ;;  %v245_v36 = vld [vmem:[#allocation7 + $0x4c8] sm:$0xff] }
  0x8d   :  { %1775 = vmatpush1.bf16.msra.mxu1 %v1774_v20  ;;  %1553 = vmatprep.subr.bf16.mxu0 %v1552_v21  ;;  %v232_v20 = vld [vmem:[#allocation7 + $0x460] sm:$0xff]  ;;  %v230_v21 = vld [vmem:[#allocation7 + $0x450] sm:$0xff]  ;;  %v1800_v34 = vpack.c.bf16 %v243_v27, %v239_v26  ;;  %v247_v38 = vld [vmem:[#allocation7 + $0x4d8] sm:$0xff] }
  0x8e   :  { %1777 = vmatprep.subr.bf16.mxu1 %v1776_v25  ;;  %v241_v25 = vld [vmem:[#allocation7 + $0x4a8] sm:$0xff]  ;;  %v1574_v28 = vpack.c.bf16 %v232_v20, %v228_v19  ;;  %v1798_v29 = vpack.c.bf16 %v234_v23, %v230_v21  ;;  %v251_v39 = vld [vmem:[#allocation7 + $0x4f8] sm:$0xff]  ;;  %v250_v47 = vld [vmem:[#allocation7 + $0x4f0] sm:$0xff] }
  0x8f   :  { %v1576_v30 = vpack.c.bf16 %v241_v25, %v237_v24  ;;  %v1804_v46 = vpack.c.bf16 %v251_v39, %v247_v38  ;;  %v253_v48 = vld [vmem:[#allocation7 + $0x508] sm:$0xff]  ;;  %v255_v50 = vld [vmem:[#allocation7 + $0x518] sm:$0xff]  ;;  %v258_v59 = vld [vmem:[#allocation7 + $0x530] sm:$0xff] }
  0x90   :  { %1555 = vmatpush1.bf16.msra.mxu0 %v1554_v31  ;;  %v236_v31 = vld [vmem:[#allocation7 + $0x480] sm:$0xff]  ;;  %v259_v51 = vld [vmem:[#allocation7 + $0x538] sm:$0xff]  ;;  %v261_v60 = vld [vmem:[#allocation7 + $0x548] sm:$0xff] }
  0x91   :  { %1779 = vmatpush1.bf16.msra.mxu1 %v1778_v32  ;;  %1557 = vmatprep.subr.bf16.mxu0 %v1556_v33  ;;  %v240_v32 = vld [vmem:[#allocation7 + $0x4a0] sm:$0xff]  ;;  %v238_v33 = vld [vmem:[#allocation7 + $0x490] sm:$0xff]  ;;  %v1808_v58 = vpack.c.bf16 %v259_v51, %v255_v50  ;;  %v263_v62 = vld [vmem:[#allocation7 + $0x558] sm:$0xff] }
  0x92   :  { %1781 = vmatprep.subr.bf16.mxu1 %v1780_v37  ;;  %v249_v37 = vld [vmem:[#allocation7 + $0x4e8] sm:$0xff]  ;;  %v1578_v40 = vpack.c.bf16 %v240_v32, %v236_v31  ;;  %v1802_v41 = vpack.c.bf16 %v242_v35, %v238_v33  ;;  %v267_v63 = vld [vmem:[#allocation7 + $0x578] sm:$0xff]  ;;  %v266_v7 = vld [vmem:[#allocation7 + $0x570] sm:$0xff] }
  0x93   :  { %v1580_v42 = vpack.c.bf16 %v249_v37, %v245_v36  ;;  %v1812_v6 = vpack.c.bf16 %v267_v63, %v263_v62  ;;  %v269_v8 = vld [vmem:[#allocation7 + $0x588] sm:$0xff]  ;;  %v271_v10 = vld [vmem:[#allocation7 + $0x598] sm:$0xff]  ;;  %v268_v13 = vld [vmem:[#allocation7 + $0x580] sm:$0xff] }
  0x94   :  { %1559 = vmatpush1.bf16.msra.mxu0 %v1558_v43  ;;  %v244_v43 = vld [vmem:[#allocation7 + $0x4c0] sm:$0xff]  ;;  %v275_v11 = vld [vmem:[#allocation7 + $0x5b8] sm:$0xff]  ;;  %v277_v20 = vld [vmem:[#allocation7 + $0x5c8] sm:$0xff] }
  0x95   :  { %1783 = vmatpush1.bf16.msra.mxu1 %v1782_v44  ;;  %1561 = vmatprep.subr.bf16.mxu0 %v1560_v45  ;;  %v248_v44 = vld [vmem:[#allocation7 + $0x4e0] sm:$0xff]  ;;  %v246_v45 = vld [vmem:[#allocation7 + $0x4d0] sm:$0xff]  ;;  %v1816_v19 = vpack.c.bf16 %v275_v11, %v271_v10  ;;  %v281_v21 = vld [vmem:[#allocation7 + $0x5e8] sm:$0xff] }
  0x96   :  { %1785 = vmatprep.subr.bf16.mxu1 %v1784_v49  ;;  %v257_v49 = vld [vmem:[#allocation7 + $0x528] sm:$0xff]  ;;  %v1582_v52 = vpack.c.bf16 %v248_v44, %v244_v43  ;;  %v1806_v53 = vpack.c.bf16 %v250_v47, %v246_v45  ;;  %v279_v23 = vld [vmem:[#allocation7 + $0x5d8] sm:$0xff]  ;;  %v1596_v27 = vpack.c.bf16 %v281_v21, %v277_v20  ;;  %v282_v32 = vld [vmem:[#allocation7 + $0x5f0] sm:$0xff] }
  0x97   :  { %v1584_v54 = vpack.c.bf16 %v257_v49, %v253_v48  ;;  %v283_v24 = vld [vmem:[#allocation7 + $0x5f8] sm:$0xff]  ;;  %v285_v33 = vld [vmem:[#allocation7 + $0x608] sm:$0xff]  ;;  %v290_v44 = vld [vmem:[#allocation7 + $0x630] sm:$0xff] }
  0x98   :  { %1563 = vmatpush1.bf16.msra.mxu0 %v1562_v55  ;;  %v252_v55 = vld [vmem:[#allocation7 + $0x500] sm:$0xff]  ;;  %v1820_v31 = vpack.c.bf16 %v283_v24, %v279_v23  ;;  %v287_v35 = vld [vmem:[#allocation7 + $0x618] sm:$0xff]  ;;  %v293_v45 = vld [vmem:[#allocation7 + $0x648] sm:$0xff] }
  0x99   :  { %1787 = vmatpush1.bf16.msra.mxu1 %v1786_v56  ;;  %1565 = vmatprep.subr.bf16.mxu0 %v1564_v57  ;;  %v256_v56 = vld [vmem:[#allocation7 + $0x520] sm:$0xff]  ;;  %v254_v57 = vld [vmem:[#allocation7 + $0x510] sm:$0xff]  ;;  %v291_v36 = vld [vmem:[#allocation7 + $0x638] sm:$0xff] }
  0x9a   :  { %1789 = vmatprep.subr.bf16.mxu1 %v1788_v61  ;;  %v265_v61 = vld [vmem:[#allocation7 + $0x568] sm:$0xff]  ;;  %v1586_v0 = vpack.c.bf16 %v256_v56, %v252_v55  ;;  %v1810_v1 = vpack.c.bf16 %v258_v59, %v254_v57  ;;  %v1824_v43 = vpack.c.bf16 %v291_v36, %v287_v35  ;;  %v295_v47 = vld [vmem:[#allocation7 + $0x658] sm:$0xff]  ;;  %v298_v56 = vld [vmem:[#allocation7 + $0x670] sm:$0xff] }
  0x9b   :  { %v1588_v2 = vpack.c.bf16 %v265_v61, %v261_v60  ;;  %v299_v48 = vld [vmem:[#allocation7 + $0x678] sm:$0xff]  ;;  %v301_v57 = vld [vmem:[#allocation7 + $0x688] sm:$0xff]  ;;  %v316_v24 = vld [vmem:[#allocation7 + $0x700] sm:$0xff] }
  0x9c   :  { %1567 = vmatpush1.bf16.msra.mxu0 %v1566_v3  ;;  %v260_v3 = vld [vmem:[#allocation7 + $0x540] sm:$0xff]  ;;  %v1828_v55 = vpack.c.bf16 %v299_v48, %v295_v47  ;;  %v303_v59 = vld [vmem:[#allocation7 + $0x698] sm:$0xff] }
  0x9d   :  { %1791 = vmatpush1.bf16.msra.mxu1 %v1790_v4  ;;  %1569 = vmatprep.subr.bf16.mxu0 %v1568_v5  ;;  %v264_v4 = vld [vmem:[#allocation7 + $0x560] sm:$0xff]  ;;  %v262_v5 = vld [vmem:[#allocation7 + $0x550] sm:$0xff]  ;;  %v307_v60 = vld [vmem:[#allocation7 + $0x6b8] sm:$0xff] }
  0x9e   :  { %1793 = vmatprep.subr.bf16.mxu1 %v1792_v9  ;;  %v273_v9 = vld [vmem:[#allocation7 + $0x5a8] sm:$0xff]  ;;  %v1590_v12 = vpack.c.bf16 %v264_v4, %v260_v3  ;;  %v1814_v14 = vpack.c.bf16 %v266_v7, %v262_v5  ;;  %v1832_v3 = vpack.c.bf16 %v307_v60, %v303_v59  ;;  %v306_v4 = vld [vmem:[#allocation7 + $0x6b0] sm:$0xff]  ;;  %v311_v7 = vld [vmem:[#allocation7 + $0x6d8] sm:$0xff] }
  0x9f   :  { %627 = vmatmul.mubr.f32.vlgmr.msra.gmra.mrb[0].mxu0 %v85_v15  ;;  %v309_v5 = vld [vmem:[#allocation7 + $0x6c8] sm:$0xff]  ;;  %v323_v20 = vld [vmem:[#allocation7 + $0x738] sm:$0xff]  ;;  %v324_v36 = vld [vmem:[#allocation7 + $0x740] sm:$0xff] }
  0xa0   :  { %1571 = vmatpush1.bf16.msra.mxu0 %v1570_v16  ;;  %911 = vmatmul.mubr.f32.vlgmr.msra.gmra.mrb[0].mxu1 %v85_v15  ;;  %v1592_v15 = vpack.c.bf16 %v273_v9, %v269_v8  ;;  %v272_v16 = vld [vmem:[#allocation7 + $0x5a0] sm:$0xff]  ;;  %v315_v8 = vld [vmem:[#allocation7 + $0x6f8] sm:$0xff] }
  0xa1   :  { %1795 = vmatpush1.bf16.msra.mxu1 %v1794_v17  ;;  %1573 = vmatprep.subr.bf16.mxu0 %v1572_v18  ;;  %v270_v17 = vld [vmem:[#allocation7 + $0x590] sm:$0xff]  ;;  %v1594_v25 = vpack.c.bf16 %v272_v16, %v268_v13  ;;  %v312_v13 = vld [vmem:[#allocation7 + $0x6e0] sm:$0xff] }
  0xa2   :  { %1797 = vmatprep.subr.bf16.mxu1 %v1796_v22  ;;  %v274_v18 = vld [vmem:[#allocation7 + $0x5b0] sm:$0xff]  ;;  %v88_v22 = vld [vmem:[#allocation4 + $0x18] sm:$0xff] }
  0xa3   :  { %697 = vmatprep.mubr.f32.mxu0 %v88_v22  ;;  %981 = vmatprep.mubr.f32.mxu1 %v88_v22  ;;  %v1818_v26 = vpack.c.bf16 %v274_v18, %v270_v17  ;;  %v314_v16 = vld [vmem:[#allocation7 + $0x6f0] sm:$0xff]  ;;  %v317_v17 = vld [vmem:[#allocation7 + $0x708] sm:$0xff]  ;;  %v332_v48 = vld [vmem:[#allocation7 + $0x780] sm:$0xff] }
  0xa4   :  { %1575 = vmatpush1.bf16.msra.mxu0 %v1574_v28  ;;  %v276_v28 = vld [vmem:[#allocation7 + $0x5c0] sm:$0xff]  ;;  %v321_v18 = vld [vmem:[#allocation7 + $0x728] sm:$0xff] }
  0xa5   :  { %1799 = vmatpush1.bf16.msra.mxu1 %v1798_v29  ;;  %1577 = vmatprep.subr.bf16.mxu0 %v1576_v30  ;;  %v280_v29 = vld [vmem:[#allocation7 + $0x5e0] sm:$0xff]  ;;  %v278_v30 = vld [vmem:[#allocation7 + $0x5d0] sm:$0xff]  ;;  %v1616_v23 = vpack.c.bf16 %v321_v18, %v317_v17  ;;  %v87_v17 = vld [vmem:[#allocation4 + $0x10] sm:$0xff] }
  0xa6   :  { %1801 = vmatprep.subr.bf16.mxu1 %v1800_v34  ;;  %v289_v34 = vld [vmem:[#allocation7 + $0x628] sm:$0xff]  ;;  %v1598_v37 = vpack.c.bf16 %v280_v29, %v276_v28  ;;  %v1822_v38 = vpack.c.bf16 %v282_v32, %v278_v30  ;;  %v322_v28 = vld [vmem:[#allocation7 + $0x730] sm:$0xff]  ;;  %v331_v32 = vld [vmem:[#allocation7 + $0x778] sm:$0xff] }
  0xa7   :  { %v1600_v39 = vpack.c.bf16 %v289_v34, %v285_v33  ;;  %v325_v29 = vld [vmem:[#allocation7 + $0x748] sm:$0xff]  ;;  %v340_v60 = vld [vmem:[#allocation7 + $0x7c0] sm:$0xff] }
  0xa8   :  { %1579 = vmatpush1.bf16.msra.mxu0 %v1578_v40  ;;  %v284_v40 = vld [vmem:[#allocation7 + $0x600] sm:$0xff]  ;;  %v329_v30 = vld [vmem:[#allocation7 + $0x768] sm:$0xff] }
  0xa9   :  { %1803 = vmatpush1.bf16.msra.mxu1 %v1802_v41  ;;  %1581 = vmatprep.subr.bf16.mxu0 %v1580_v42  ;;  %v288_v41 = vld [vmem:[#allocation7 + $0x620] sm:$0xff]  ;;  %v286_v42 = vld [vmem:[#allocation7 + $0x610] sm:$0xff]  ;;  %v1620_v35 = vpack.c.bf16 %v329_v30, %v325_v29  ;;  %v371_v29 = vld [vmem:[#allocation7 + $0x8b8] sm:$0xff] }
  0xaa   :  { %1805 = vmatprep.subr.bf16.mxu1 %v1804_v46  ;;  %v297_v46 = vld [vmem:[#allocation7 + $0x668] sm:$0xff]  ;;  %v1602_v49 = vpack.c.bf16 %v288_v41, %v284_v40  ;;  %v1826_v50 = vpack.c.bf16 %v290_v44, %v286_v42  ;;  %v330_v40 = vld [vmem:[#allocation7 + $0x770] sm:$0xff]  ;;  %v339_v44 = vld [vmem:[#allocation7 + $0x7b8] sm:$0xff] }
  0xab   :  { %v1604_v51 = vpack.c.bf16 %v297_v46, %v293_v45  ;;  %v333_v41 = vld [vmem:[#allocation7 + $0x788] sm:$0xff]  ;;  %v90_v30 = vld [vmem:[#allocation4 + $0x28] sm:$0xff] }
  0xac   :  { %1583 = vmatpush1.bf16.msra.mxu0 %v1582_v52  ;;  %v292_v52 = vld [vmem:[#allocation7 + $0x640] sm:$0xff]  ;;  %v337_v42 = vld [vmem:[#allocation7 + $0x7a8] sm:$0xff] }
  0xad   :  { %1807 = vmatpush1.bf16.msra.mxu1 %v1806_v53  ;;  %1585 = vmatprep.subr.bf16.mxu0 %v1584_v54  ;;  %v296_v53 = vld [vmem:[#allocation7 + $0x660] sm:$0xff]  ;;  %v294_v54 = vld [vmem:[#allocation7 + $0x650] sm:$0xff]  ;;  %v1624_v47 = vpack.c.bf16 %v337_v42, %v333_v41  ;;  %v375_v41 = vld [vmem:[#allocation7 + $0x8d8] sm:$0xff] }
  0xae   :  { %1809 = vmatprep.subr.bf16.mxu1 %v1808_v58  ;;  %v305_v58 = vld [vmem:[#allocation7 + $0x6a8] sm:$0xff]  ;;  %v1606_v61 = vpack.c.bf16 %v296_v53, %v292_v52  ;;  %v1830_v62 = vpack.c.bf16 %v298_v56, %v294_v54  ;;  %v338_v52 = vld [vmem:[#allocation7 + $0x7b0] sm:$0xff]  ;;  %v347_v56 = vld [vmem:[#allocation7 + $0x7f8] sm:$0xff] }
  0xaf   :  { %v1608_v63 = vpack.c.bf16 %v305_v58, %v301_v57  ;;  %v341_v53 = vld [vmem:[#allocation7 + $0x7c8] sm:$0xff]  ;;  %v379_v42 = vld [vmem:[#allocation7 + $0x8f8] sm:$0xff] }
  0xb0   :  { %1587 = vmatpush1.bf16.msra.mxu0 %v1586_v0  ;;  %v300_v0 = vld [vmem:[#allocation7 + $0x680] sm:$0xff]  ;;  %v345_v54 = vld [vmem:[#allocation7 + $0x7e8] sm:$0xff] }
  0xb1   :  { %1811 = vmatpush1.bf16.msra.mxu1 %v1810_v1  ;;  %1589 = vmatprep.subr.bf16.mxu0 %v1588_v2  ;;  %v304_v1 = vld [vmem:[#allocation7 + $0x6a0] sm:$0xff]  ;;  %v302_v2 = vld [vmem:[#allocation7 + $0x690] sm:$0xff]  ;;  %v1628_v59 = vpack.c.bf16 %v345_v54, %v341_v53  ;;  %v383_v53 = vld [vmem:[#allocation7 + $0x918] sm:$0xff] }
  0xb2   :  { %1813 = vmatprep.subr.bf16.mxu1 %v1812_v6  ;;  %v313_v6 = vld [vmem:[#allocation7 + $0x6e8] sm:$0xff]  ;;  %v1610_v9 = vpack.c.bf16 %v304_v1, %v300_v0  ;;  %v1834_v10 = vpack.c.bf16 %v306_v4, %v302_v2  ;;  %v346_v0 = vld [vmem:[#allocation7 + $0x7f0] sm:$0xff]  ;;  %v355_v4 = vld [vmem:[#allocation7 + $0x838] sm:$0xff] }
  0xb3   :  { %v1612_v11 = vpack.c.bf16 %v313_v6, %v309_v5  ;;  %v349_v1 = vld [vmem:[#allocation7 + $0x808] sm:$0xff]  ;;  %v387_v54 = vld [vmem:[#allocation7 + $0x938] sm:$0xff] }
  0xb4   :  { %1591 = vmatpush1.bf16.msra.mxu0 %v1590_v12  ;;  %v308_v12 = vld [vmem:[#allocation7 + $0x6c0] sm:$0xff]  ;;  %v353_v2 = vld [vmem:[#allocation7 + $0x828] sm:$0xff] }
  0xb5   :  { %1815 = vmatpush1.bf16.msra.mxu1 %v1814_v14  ;;  %1593 = vmatprep.subr.bf16.mxu0 %v1592_v15  ;;  %v310_v14 = vld [vmem:[#allocation7 + $0x6d0] sm:$0xff]  ;;  %v1836_v15 = vpack.c.bf16 %v315_v8, %v311_v7  ;;  %v1614_v21 = vpack.c.bf16 %v312_v13, %v308_v12  ;;  %v1632_v7 = vpack.c.bf16 %v353_v2, %v349_v1  ;;  %v348_v8 = vld [vmem:[#allocation7 + $0x800] sm:$0xff]  ;;  %v357_v13 = vld [vmem:[#allocation7 + $0x848] sm:$0xff] }
  0xb6   :  { %1817 = vmatprep.subr.bf16.mxu1 %v1816_v19  ;;  %v319_v19 = vld [vmem:[#allocation7 + $0x718] sm:$0xff]  ;;  %v1838_v22 = vpack.c.bf16 %v314_v16, %v310_v14  ;;  %v354_v12 = vld [vmem:[#allocation7 + $0x830] sm:$0xff]  ;;  %v361_v14 = vld [vmem:[#allocation7 + $0x868] sm:$0xff] }
  0xb7   :  { %v363_v16 = vld [vmem:[#allocation7 + $0x878] sm:$0xff] }
  0xb8   :  { %1595 = vmatpush1.bf16.msra.mxu0 %v1594_v25  ;;  %v320_v25 = vld [vmem:[#allocation7 + $0x720] sm:$0xff]  ;;  %v391_v1 = vld [vmem:[#allocation7 + $0x958] sm:$0xff] }
  0xb9   :  { %1819 = vmatpush1.bf16.msra.mxu1 %v1818_v26  ;;  %1597 = vmatprep.subr.bf16.mxu0 %v1596_v27  ;;  %v318_v26 = vld [vmem:[#allocation7 + $0x710] sm:$0xff]  ;;  %v1840_v27 = vpack.c.bf16 %v323_v20, %v319_v19  ;;  %v1618_v33 = vpack.c.bf16 %v320_v25, %v316_v24  ;;  %v1636_v20 = vpack.c.bf16 %v361_v14, %v357_v13  ;;  %v395_v2 = vld [vmem:[#allocation7 + $0x978] sm:$0xff] }
  0xba   :  { %1821 = vmatprep.subr.bf16.mxu1 %v1820_v31  ;;  %v327_v31 = vld [vmem:[#allocation7 + $0x758] sm:$0xff]  ;;  %v1842_v34 = vpack.c.bf16 %v322_v28, %v318_v26  ;;  %v362_v25 = vld [vmem:[#allocation7 + $0x870] sm:$0xff]  ;;  %v365_v26 = vld [vmem:[#allocation7 + $0x888] sm:$0xff] }
  0xbb   :  { %v367_v28 = vld [vmem:[#allocation7 + $0x898] sm:$0xff] }
  0xbc   :  { %1599 = vmatpush1.bf16.msra.mxu0 %v1598_v37  ;;  %v328_v37 = vld [vmem:[#allocation7 + $0x760] sm:$0xff]  ;;  %v399_v13 = vld [vmem:[#allocation7 + $0x998] sm:$0xff] }
  0xbd   :  { %1823 = vmatpush1.bf16.msra.mxu1 %v1822_v38  ;;  %1601 = vmatprep.subr.bf16.mxu0 %v1600_v39  ;;  %v326_v38 = vld [vmem:[#allocation7 + $0x750] sm:$0xff]  ;;  %v1844_v39 = vpack.c.bf16 %v331_v32, %v327_v31  ;;  %v1622_v45 = vpack.c.bf16 %v328_v37, %v324_v36  ;;  %v1864_v37 = vpack.c.bf16 %v371_v29, %v367_v28  ;;  %v403_v14 = vld [vmem:[#allocation7 + $0x9b8] sm:$0xff] }
  0xbe   :  { %1825 = vmatprep.subr.bf16.mxu1 %v1824_v43  ;;  %v335_v43 = vld [vmem:[#allocation7 + $0x798] sm:$0xff]  ;;  %v1846_v46 = vpack.c.bf16 %v330_v40, %v326_v38  ;;  %v366_v36 = vld [vmem:[#allocation7 + $0x890] sm:$0xff]  ;;  %v377_v40 = vld [vmem:[#allocation7 + $0x8e8] sm:$0xff] }
  0xbf   :  { %v370_v38 = vld [vmem:[#allocation7 + $0x8b0] sm:$0xff] }
  0xc0   :  { %1603 = vmatpush1.bf16.msra.mxu0 %v1602_v49  ;;  %v336_v49 = vld [vmem:[#allocation7 + $0x7a0] sm:$0xff] }
  0xc1   :  { %1827 = vmatpush1.bf16.msra.mxu1 %v1826_v50  ;;  %1605 = vmatprep.subr.bf16.mxu0 %v1604_v51  ;;  %v334_v50 = vld [vmem:[#allocation7 + $0x790] sm:$0xff]  ;;  %v1848_v51 = vpack.c.bf16 %v339_v44, %v335_v43  ;;  %v1626_v57 = vpack.c.bf16 %v336_v49, %v332_v48  ;;  %v1866_v44 = vpack.c.bf16 %v370_v38, %v366_v36  ;;  %v417_v36 = vld [vmem:[#allocation7 + $0xa28] sm:$0xff]  ;;  %v419_v38 = vld [vmem:[#allocation7 + $0xa38] sm:$0xff] }
  0xc2   :  { %1829 = vmatprep.subr.bf16.mxu1 %v1828_v55  ;;  %v343_v55 = vld [vmem:[#allocation7 + $0x7d8] sm:$0xff]  ;;  %v1850_v58 = vpack.c.bf16 %v338_v52, %v334_v50  ;;  %v374_v48 = vld [vmem:[#allocation7 + $0x8d0] sm:$0xff]  ;;  %v1868_v49 = vpack.c.bf16 %v379_v42, %v375_v41  ;;  %v385_v52 = vld [vmem:[#allocation7 + $0x928] sm:$0xff] }
  0xc3   :  { %v378_v50 = vld [vmem:[#allocation7 + $0x8f0] sm:$0xff]  ;;  %v412_v42 = vld [vmem:[#allocation7 + $0xa00] sm:$0xff] }
  0xc4   :  { %1607 = vmatpush1.bf16.msra.mxu0 %v1606_v61  ;;  %v344_v61 = vld [vmem:[#allocation7 + $0x7e0] sm:$0xff] }
  0xc5   :  { %1831 = vmatpush1.bf16.msra.mxu1 %v1830_v62  ;;  %1609 = vmatprep.subr.bf16.mxu0 %v1608_v63  ;;  %v342_v62 = vld [vmem:[#allocation7 + $0x7d0] sm:$0xff]  ;;  %v1852_v63 = vpack.c.bf16 %v347_v56, %v343_v55  ;;  %v1630_v5 = vpack.c.bf16 %v344_v61, %v340_v60  ;;  %v1870_v56 = vpack.c.bf16 %v378_v50, %v374_v48  ;;  %v425_v48 = vld [vmem:[#allocation7 + $0xa68] sm:$0xff]  ;;  %v427_v50 = vld [vmem:[#allocation7 + $0xa78] sm:$0xff] }
  0xc6   :  { %1833 = vmatprep.subr.bf16.mxu1 %v1832_v3  ;;  %v351_v3 = vld [vmem:[#allocation7 + $0x818] sm:$0xff]  ;;  %v1854_v6 = vpack.c.bf16 %v346_v0, %v342_v62  ;;  %v382_v60 = vld [vmem:[#allocation7 + $0x910] sm:$0xff]  ;;  %v1872_v61 = vpack.c.bf16 %v387_v54, %v383_v53  ;;  %v393_v0 = vld [vmem:[#allocation7 + $0x968] sm:$0xff] }
  0xc7   :  { %v386_v62 = vld [vmem:[#allocation7 + $0x930] sm:$0xff]  ;;  %v420_v54 = vld [vmem:[#allocation7 + $0xa40] sm:$0xff] }
  0xc8   :  { %1611 = vmatpush1.bf16.msra.mxu0 %v1610_v9  ;;  %v352_v9 = vld [vmem:[#allocation7 + $0x820] sm:$0xff] }
  0xc9   :  { %1835 = vmatpush1.bf16.msra.mxu1 %v1834_v10  ;;  %1613 = vmatprep.subr.bf16.mxu0 %v1612_v11  ;;  %v350_v10 = vld [vmem:[#allocation7 + $0x810] sm:$0xff]  ;;  %v1856_v11 = vpack.c.bf16 %v355_v4, %v351_v3  ;;  %v1634_v18 = vpack.c.bf16 %v352_v9, %v348_v8  ;;  %v1874_v4 = vpack.c.bf16 %v386_v62, %v382_v60  ;;  %v433_v60 = vld [vmem:[#allocation7 + $0xaa8] sm:$0xff]  ;;  %v435_v62 = vld [vmem:[#allocation7 + $0xab8] sm:$0xff] }
  0xca   :  { %1837 = vmatprep.subr.bf16.mxu1 %v1836_v15  ;;  %v359_v15 = vld [vmem:[#allocation7 + $0x858] sm:$0xff]  ;;  %v1858_v19 = vpack.c.bf16 %v354_v12, %v350_v10  ;;  %v390_v8 = vld [vmem:[#allocation7 + $0x950] sm:$0xff]  ;;  %v1876_v9 = vpack.c.bf16 %v395_v2, %v391_v1  ;;  %v401_v12 = vld [vmem:[#allocation7 + $0x9a8] sm:$0xff] }
  0xcb   :  { %v1860_v24 = vpack.c.bf16 %v363_v16, %v359_v15  ;;  %v394_v10 = vld [vmem:[#allocation7 + $0x970] sm:$0xff]  ;;  %v428_v2 = vld [vmem:[#allocation7 + $0xa80] sm:$0xff] }
  0xcc   :  { %1615 = vmatpush1.bf16.msra.mxu0 %v1614_v21  ;;  %v356_v21 = vld [vmem:[#allocation7 + $0x840] sm:$0xff]  ;;  %v1878_v16 = vpack.c.bf16 %v394_v10, %v390_v8  ;;  %v441_v8 = vld [vmem:[#allocation7 + $0xae8] sm:$0xff]  ;;  %v443_v10 = vld [vmem:[#allocation7 + $0xaf8] sm:$0xff] }
  0xcd   :  { %1839 = vmatpush1.bf16.msra.mxu1 %v1838_v22  ;;  %1617 = vmatprep.subr.bf16.mxu0 %v1616_v23  ;;  %v360_v22 = vld [vmem:[#allocation7 + $0x860] sm:$0xff]  ;;  %v358_v23 = vld [vmem:[#allocation7 + $0x850] sm:$0xff] }
  0xce   :  { %1841 = vmatprep.subr.bf16.mxu1 %v1840_v27  ;;  %v369_v27 = vld [vmem:[#allocation7 + $0x8a8] sm:$0xff]  ;;  %v1638_v31 = vpack.c.bf16 %v360_v22, %v356_v21  ;;  %v1862_v32 = vpack.c.bf16 %v362_v25, %v358_v23  ;;  %v1880_v21 = vpack.c.bf16 %v403_v14, %v399_v13  ;;  %v402_v22 = vld [vmem:[#allocation7 + $0x9b0] sm:$0xff]  ;;  %v407_v25 = vld [vmem:[#allocation7 + $0x9d8] sm:$0xff] }
  0xcf   :  { %v405_v23 = vld [vmem:[#allocation7 + $0x9c8] sm:$0xff]  ;;  %v436_v14 = vld [vmem:[#allocation7 + $0xac0] sm:$0xff] }
  0xd0   :  { %1619 = vmatpush1.bf16.msra.mxu0 %v1618_v33  ;;  %v1640_v33 = vpack.c.bf16 %v369_v27, %v365_v26  ;;  %v411_v26 = vld [vmem:[#allocation7 + $0x9f8] sm:$0xff] }
  0xd1   :  { %1843 = vmatpush1.bf16.msra.mxu1 %v1842_v34  ;;  %1621 = vmatprep.subr.bf16.mxu0 %v1620_v35  ;;  %v364_v34 = vld [vmem:[#allocation7 + $0x880] sm:$0xff] }
  0xd2   :  { %1845 = vmatprep.subr.bf16.mxu1 %v1844_v39  ;;  %v368_v35 = vld [vmem:[#allocation7 + $0x8a0] sm:$0xff]  ;;  %v373_v39 = vld [vmem:[#allocation7 + $0x8c8] sm:$0xff] }
  0xd3   :  { %v1642_v43 = vpack.c.bf16 %v368_v35, %v364_v34  ;;  %v410_v34 = vld [vmem:[#allocation7 + $0x9f0] sm:$0xff]  ;;  %v413_v35 = vld [vmem:[#allocation7 + $0xa08] sm:$0xff] }
  0xd4   :  { %1623 = vmatpush1.bf16.msra.mxu0 %v1622_v45  ;;  %v1644_v45 = vpack.c.bf16 %v377_v40, %v373_v39  ;;  %v1664_v41 = vpack.c.bf16 %v417_v36, %v413_v35 }
  0xd5   :  { %1847 = vmatpush1.bf16.msra.mxu1 %v1846_v46  ;;  %1625 = vmatprep.subr.bf16.mxu0 %v1624_v47  ;;  %v372_v46 = vld [vmem:[#allocation7 + $0x8c0] sm:$0xff] }
  0xd6   :  { %1849 = vmatprep.subr.bf16.mxu1 %v1848_v51  ;;  %v376_v47 = vld [vmem:[#allocation7 + $0x8e0] sm:$0xff]  ;;  %v381_v51 = vld [vmem:[#allocation7 + $0x908] sm:$0xff] }
  0xd7   :  { %v1646_v55 = vpack.c.bf16 %v376_v47, %v372_v46  ;;  %v418_v46 = vld [vmem:[#allocation7 + $0xa30] sm:$0xff]  ;;  %v421_v47 = vld [vmem:[#allocation7 + $0xa48] sm:$0xff] }
  0xd8   :  { %1627 = vmatpush1.bf16.msra.mxu0 %v1626_v57  ;;  %v1648_v57 = vpack.c.bf16 %v385_v52, %v381_v51  ;;  %v1668_v53 = vpack.c.bf16 %v425_v48, %v421_v47 }
  0xd9   :  { %1851 = vmatpush1.bf16.msra.mxu1 %v1850_v58  ;;  %1629 = vmatprep.subr.bf16.mxu0 %v1628_v59  ;;  %v380_v58 = vld [vmem:[#allocation7 + $0x900] sm:$0xff] }
  0xda   :  { %1853 = vmatprep.subr.bf16.mxu1 %v1852_v63  ;;  %v384_v59 = vld [vmem:[#allocation7 + $0x920] sm:$0xff]  ;;  %v389_v63 = vld [vmem:[#allocation7 + $0x948] sm:$0xff] }
  0xdb   :  { %v1650_v3 = vpack.c.bf16 %v384_v59, %v380_v58  ;;  %v426_v58 = vld [vmem:[#allocation7 + $0xa70] sm:$0xff]  ;;  %v429_v59 = vld [vmem:[#allocation7 + $0xa88] sm:$0xff] }
  0xdc   :  { %1631 = vmatpush1.bf16.msra.mxu0 %v1630_v5  ;;  %v1652_v5 = vpack.c.bf16 %v393_v0, %v389_v63  ;;  %v1672_v1 = vpack.c.bf16 %v433_v60, %v429_v59 }
  0xdd   :  { %1855 = vmatpush1.bf16.msra.mxu1 %v1854_v6  ;;  %1633 = vmatprep.subr.bf16.mxu0 %v1632_v7  ;;  %v388_v6 = vld [vmem:[#allocation7 + $0x940] sm:$0xff] }
  0xde   :  { %1857 = vmatprep.subr.bf16.mxu1 %v1856_v11  ;;  %v392_v7 = vld [vmem:[#allocation7 + $0x960] sm:$0xff]  ;;  %v397_v11 = vld [vmem:[#allocation7 + $0x988] sm:$0xff] }
  0xdf   :  { %698 = vmatmul.mubr.f32.vlgmr.msra.gmra.mrb[0].mxu0 %v87_v17  ;;  %v1654_v15 = vpack.c.bf16 %v392_v7, %v388_v6  ;;  %v434_v6 = vld [vmem:[#allocation7 + $0xab0] sm:$0xff]  ;;  %v437_v7 = vld [vmem:[#allocation7 + $0xac8] sm:$0xff] }
  0xe0   :  { %1635 = vmatpush1.bf16.msra.mxu0 %v1634_v18  ;;  %982 = vmatmul.mubr.f32.vlgmr.msra.gmra.mrb[0].mxu1 %v87_v17  ;;  %v1656_v17 = vpack.c.bf16 %v401_v12, %v397_v11  ;;  %v396_v18 = vld [vmem:[#allocation7 + $0x980] sm:$0xff]  ;;  %v1676_v13 = vpack.c.bf16 %v441_v8, %v437_v7 }
  0xe1   :  { %1859 = vmatpush1.bf16.msra.mxu1 %v1858_v19  ;;  %1637 = vmatprep.subr.bf16.mxu0 %v1636_v20  ;;  %v400_v19 = vld [vmem:[#allocation7 + $0x9a0] sm:$0xff]  ;;  %v398_v20 = vld [vmem:[#allocation7 + $0x990] sm:$0xff] }
  0xe2   :  { %1861 = vmatprep.subr.bf16.mxu1 %v1860_v24  ;;  %768 = vmatprep.mubr.f32.mxu0 %v90_v30  ;;  %v409_v24 = vld [vmem:[#allocation7 + $0x9e8] sm:$0xff]  ;;  %v1658_v27 = vpack.c.bf16 %v400_v19, %v396_v18  ;;  %v1882_v28 = vpack.c.bf16 %v402_v22, %v398_v20  ;;  %v442_v18 = vld [vmem:[#allocation7 + $0xaf0] sm:$0xff]  ;;  %v451_v22 = vld [vmem:[#allocation7 + $0xb38] sm:$0xff] }
  0xe3   :  { %1052 = vmatprep.mubr.f32.mxu1 %v90_v30  ;;  %v1660_v29 = vpack.c.bf16 %v409_v24, %v405_v23  ;;  %v404_v30 = vld [vmem:[#allocation7 + $0x9c0] sm:$0xff]  ;;  %v445_v19 = vld [vmem:[#allocation7 + $0xb08] sm:$0xff] }
  0xe4   :  { %1639 = vmatpush1.bf16.msra.mxu0 %v1638_v31  ;;  %v408_v31 = vld [vmem:[#allocation7 + $0x9e0] sm:$0xff]  ;;  %v449_v20 = vld [vmem:[#allocation7 + $0xb28] sm:$0xff] }
  0xe5   :  { %1863 = vmatpush1.bf16.msra.mxu1 %v1862_v32  ;;  %1641 = vmatprep.subr.bf16.mxu0 %v1640_v33  ;;  %v406_v32 = vld [vmem:[#allocation7 + $0x9d0] sm:$0xff]  ;;  %v1884_v33 = vpack.c.bf16 %v411_v26, %v407_v25  ;;  %v1662_v39 = vpack.c.bf16 %v408_v31, %v404_v30  ;;  %v1680_v25 = vpack.c.bf16 %v449_v20, %v445_v19  ;;  %v444_v26 = vld [vmem:[#allocation7 + $0xb00] sm:$0xff]  ;;  %v453_v31 = vld [vmem:[#allocation7 + $0xb48] sm:$0xff] }
  0xe6   :  { %1865 = vmatprep.subr.bf16.mxu1 %v1864_v37  ;;  %v415_v37 = vld [vmem:[#allocation7 + $0xa18] sm:$0xff]  ;;  %v1886_v40 = vpack.c.bf16 %v410_v34, %v406_v32  ;;  %v450_v30 = vld [vmem:[#allocation7 + $0xb30] sm:$0xff]  ;;  %v457_v32 = vld [vmem:[#allocation7 + $0xb68] sm:$0xff] }
  0xe7   :  { %v459_v34 = vld [vmem:[#allocation7 + $0xb78] sm:$0xff]  ;;  %v89_v19 = vld [vmem:[#allocation4 + $0x20] sm:$0xff] }
  0xe8   :  { %1643 = vmatpush1.bf16.msra.mxu0 %v1642_v43  ;;  %v416_v43 = vld [vmem:[#allocation7 + $0xa20] sm:$0xff] }
  0xe9   :  { %1867 = vmatpush1.bf16.msra.mxu1 %v1866_v44  ;;  %1645 = vmatprep.subr.bf16.mxu0 %v1644_v45  ;;  %v414_v44 = vld [vmem:[#allocation7 + $0xa10] sm:$0xff]  ;;  %v1888_v45 = vpack.c.bf16 %v419_v38, %v415_v37  ;;  %v1666_v51 = vpack.c.bf16 %v416_v43, %v412_v42  ;;  %v1684_v37 = vpack.c.bf16 %v457_v32, %v453_v31  ;;  %v452_v38 = vld [vmem:[#allocation7 + $0xb40] sm:$0xff]  ;;  %v461_v43 = vld [vmem:[#allocation7 + $0xb88] sm:$0xff] }
  0xea   :  { %1869 = vmatprep.subr.bf16.mxu1 %v1868_v49  ;;  %v423_v49 = vld [vmem:[#allocation7 + $0xa58] sm:$0xff]  ;;  %v1890_v52 = vpack.c.bf16 %v418_v46, %v414_v44  ;;  %v458_v42 = vld [vmem:[#allocation7 + $0xb70] sm:$0xff]  ;;  %v465_v44 = vld [vmem:[#allocation7 + $0xba8] sm:$0xff] }
  0xeb   :  { %v467_v46 = vld [vmem:[#allocation7 + $0xbb8] sm:$0xff] }
  0xec   :  { %1647 = vmatpush1.bf16.msra.mxu0 %v1646_v55  ;;  %v424_v55 = vld [vmem:[#allocation7 + $0xa60] sm:$0xff]  ;;  %v499_v31 = vld [vmem:[#allocation7 + $0xcb8] sm:$0xff] }
  0xed   :  { %1871 = vmatpush1.bf16.msra.mxu1 %v1870_v56  ;;  %1649 = vmatprep.subr.bf16.mxu0 %v1648_v57  ;;  %v422_v56 = vld [vmem:[#allocation7 + $0xa50] sm:$0xff]  ;;  %v1892_v57 = vpack.c.bf16 %v427_v50, %v423_v49  ;;  %v1670_v63 = vpack.c.bf16 %v424_v55, %v420_v54  ;;  %v1688_v49 = vpack.c.bf16 %v465_v44, %v461_v43  ;;  %v460_v50 = vld [vmem:[#allocation7 + $0xb80] sm:$0xff]  ;;  %v469_v55 = vld [vmem:[#allocation7 + $0xbc8] sm:$0xff] }
  0xee   :  { %1873 = vmatprep.subr.bf16.mxu1 %v1872_v61  ;;  %v431_v61 = vld [vmem:[#allocation7 + $0xa98] sm:$0xff]  ;;  %v1894_v0 = vpack.c.bf16 %v426_v58, %v422_v56  ;;  %v466_v54 = vld [vmem:[#allocation7 + $0xbb0] sm:$0xff]  ;;  %v473_v56 = vld [vmem:[#allocation7 + $0xbe8] sm:$0xff] }
  0xef   :  { %v475_v58 = vld [vmem:[#allocation7 + $0xbf8] sm:$0xff] }
  0xf0   :  { %1651 = vmatpush1.bf16.msra.mxu0 %v1650_v3  ;;  %v432_v3 = vld [vmem:[#allocation7 + $0xaa0] sm:$0xff]  ;;  %v503_v43 = vld [vmem:[#allocation7 + $0xcd8] sm:$0xff] }
  0xf1   :  { %1875 = vmatpush1.bf16.msra.mxu1 %v1874_v4  ;;  %1653 = vmatprep.subr.bf16.mxu0 %v1652_v5  ;;  %v430_v4 = vld [vmem:[#allocation7 + $0xa90] sm:$0xff]  ;;  %v1896_v5 = vpack.c.bf16 %v435_v62, %v431_v61  ;;  %v1674_v11 = vpack.c.bf16 %v432_v3, %v428_v2  ;;  %v1692_v61 = vpack.c.bf16 %v473_v56, %v469_v55  ;;  %v468_v62 = vld [vmem:[#allocation7 + $0xbc0] sm:$0xff]  ;;  %v477_v3 = vld [vmem:[#allocation7 + $0xc08] sm:$0xff] }
  0xf2   :  { %1877 = vmatprep.subr.bf16.mxu1 %v1876_v9  ;;  %v439_v9 = vld [vmem:[#allocation7 + $0xad8] sm:$0xff]  ;;  %v1898_v12 = vpack.c.bf16 %v434_v6, %v430_v4  ;;  %v474_v2 = vld [vmem:[#allocation7 + $0xbf0] sm:$0xff]  ;;  %v481_v4 = vld [vmem:[#allocation7 + $0xc28] sm:$0xff] }
  0xf3   :  { %v483_v6 = vld [vmem:[#allocation7 + $0xc38] sm:$0xff] }
  0xf4   :  { %1655 = vmatpush1.bf16.msra.mxu0 %v1654_v15  ;;  %v440_v15 = vld [vmem:[#allocation7 + $0xae0] sm:$0xff]  ;;  %v507_v44 = vld [vmem:[#allocation7 + $0xcf8] sm:$0xff] }
  0xf5   :  { %1879 = vmatpush1.bf16.msra.mxu1 %v1878_v16  ;;  %1657 = vmatprep.subr.bf16.mxu0 %v1656_v17  ;;  %v438_v16 = vld [vmem:[#allocation7 + $0xad0] sm:$0xff]  ;;  %v1900_v17 = vpack.c.bf16 %v443_v10, %v439_v9  ;;  %v1678_v23 = vpack.c.bf16 %v440_v15, %v436_v14  ;;  %v1696_v9 = vpack.c.bf16 %v481_v4, %v477_v3  ;;  %v476_v10 = vld [vmem:[#allocation7 + $0xc00] sm:$0xff]  ;;  %v485_v15 = vld [vmem:[#allocation7 + $0xc48] sm:$0xff] }
  0xf6   :  { %1881 = vmatprep.subr.bf16.mxu1 %v1880_v21  ;;  %v447_v21 = vld [vmem:[#allocation7 + $0xb18] sm:$0xff]  ;;  %v1902_v24 = vpack.c.bf16 %v442_v18, %v438_v16  ;;  %v482_v14 = vld [vmem:[#allocation7 + $0xc30] sm:$0xff]  ;;  %v489_v16 = vld [vmem:[#allocation7 + $0xc68] sm:$0xff] }
  0xf7   :  { %v491_v18 = vld [vmem:[#allocation7 + $0xc78] sm:$0xff] }
  0xf8   :  { %1659 = vmatpush1.bf16.msra.mxu0 %v1658_v27  ;;  %v448_v27 = vld [vmem:[#allocation7 + $0xb20] sm:$0xff]  ;;  %v511_v55 = vld [vmem:[#allocation7 + $0xd18] sm:$0xff] }
  0xf9   :  { %1883 = vmatpush1.bf16.msra.mxu1 %v1882_v28  ;;  %1661 = vmatprep.subr.bf16.mxu0 %v1660_v29  ;;  %v446_v28 = vld [vmem:[#allocation7 + $0xb10] sm:$0xff]  ;;  %v1904_v29 = vpack.c.bf16 %v451_v22, %v447_v21  ;;  %v1682_v35 = vpack.c.bf16 %v448_v27, %v444_v26  ;;  %v1700_v22 = vpack.c.bf16 %v489_v16, %v485_v15  ;;  %v515_v56 = vld [vmem:[#allocation7 + $0xd38] sm:$0xff] }
  0xfa   :  { %1885 = vmatprep.subr.bf16.mxu1 %v1884_v33  ;;  %v455_v33 = vld [vmem:[#allocation7 + $0xb58] sm:$0xff]  ;;  %v1906_v36 = vpack.c.bf16 %v450_v30, %v446_v28  ;;  %v490_v27 = vld [vmem:[#allocation7 + $0xc70] sm:$0xff]  ;;  %v493_v28 = vld [vmem:[#allocation7 + $0xc88] sm:$0xff] }
  0xfb   :  { %v495_v30 = vld [vmem:[#allocation7 + $0xc98] sm:$0xff] }
  0xfc   :  { %1663 = vmatpush1.bf16.msra.mxu0 %v1662_v39  ;;  %v456_v39 = vld [vmem:[#allocation7 + $0xb60] sm:$0xff]  ;;  %v519_v3 = vld [vmem:[#allocation7 + $0xd58] sm:$0xff] }
  0xfd   :  { %1887 = vmatpush1.bf16.msra.mxu1 %v1886_v40  ;;  %1665 = vmatprep.subr.bf16.mxu0 %v1664_v41  ;;  %v454_v40 = vld [vmem:[#allocation7 + $0xb50] sm:$0xff]  ;;  %v1908_v41 = vpack.c.bf16 %v459_v34, %v455_v33  ;;  %v1686_v47 = vpack.c.bf16 %v456_v39, %v452_v38  ;;  %v1928_v38 = vpack.c.bf16 %v499_v31, %v495_v30  ;;  %v523_v4 = vld [vmem:[#allocation7 + $0xd78] sm:$0xff] }
  0xfe   :  { %1889 = vmatprep.subr.bf16.mxu1 %v1888_v45  ;;  %v463_v45 = vld [vmem:[#allocation7 + $0xb98] sm:$0xff]  ;;  %v1910_v48 = vpack.c.bf16 %v458_v42, %v454_v40  ;;  %v498_v39 = vld [vmem:[#allocation7 + $0xcb0] sm:$0xff]  ;;  %v501_v40 = vld [vmem:[#allocation7 + $0xcc8] sm:$0xff]  ;;  %v2192_v42 = vmov 0.0  }
  0xff   :  { %v527_v15 = vld [vmem:[#allocation7 + $0xd98] sm:$0xff] }
 0x100   :  { %1667 = vmatpush1.bf16.msra.mxu0 %v1666_v51  ;;  %v464_v51 = vld [vmem:[#allocation7 + $0xba0] sm:$0xff]  ;;  %v531_v16 = vld [vmem:[#allocation7 + $0xdb8] sm:$0xff] }
 0x101   :  { %1891 = vmatpush1.bf16.msra.mxu1 %v1890_v52  ;;  %1669 = vmatprep.subr.bf16.mxu0 %v1668_v53  ;;  %v462_v52 = vld [vmem:[#allocation7 + $0xb90] sm:$0xff]  ;;  %v1912_v53 = vpack.c.bf16 %v467_v46, %v463_v45  ;;  %v1690_v59 = vpack.c.bf16 %v464_v51, %v460_v50  ;;  %v1932_v51 = vpack.c.bf16 %v507_v44, %v503_v43  ;;  %v1200_v44 = vld [vmem:[#allocation10] sm:$0xff] }
 0x102   :  { %1893 = vmatprep.subr.bf16.mxu1 %v1892_v57  ;;  %v471_v57 = vld [vmem:[#allocation7 + $0xbd8] sm:$0xff]  ;;  %v1914_v60 = vpack.c.bf16 %v466_v54, %v462_v52  ;;  %v502_v50 = vld [vmem:[#allocation7 + $0xcd0] sm:$0xff]  ;;  %v513_v54 = vld [vmem:[#allocation7 + $0xd28] sm:$0xff] }
 0x103   :  { %v506_v52 = vld [vmem:[#allocation7 + $0xcf0] sm:$0xff] }
 0x104   :  { %1671 = vmatpush1.bf16.msra.mxu0 %v1670_v63  ;;  %v472_v63 = vld [vmem:[#allocation7 + $0xbe0] sm:$0xff] }
 0x105   :  { %1895 = vmatpush1.bf16.msra.mxu1 %v1894_v0  ;;  %1673 = vmatprep.subr.bf16.mxu0 %v1672_v1  ;;  %v470_v0 = vld [vmem:[#allocation7 + $0xbd0] sm:$0xff]  ;;  %v1916_v1 = vpack.c.bf16 %v475_v58, %v471_v57  ;;  %v1694_v7 = vpack.c.bf16 %v472_v63, %v468_v62  ;;  %v1934_v58 = vpack.c.bf16 %v506_v52, %v502_v50  ;;  %v1219_v50 = vld [vmem:[#allocation10 + $0x98] sm:$0xff] }
 0x106   :  { %1897 = vmatprep.subr.bf16.mxu1 %v1896_v5  ;;  %v479_v5 = vld [vmem:[#allocation7 + $0xc18] sm:$0xff]  ;;  %v1918_v8 = vpack.c.bf16 %v474_v2, %v470_v0  ;;  %v510_v62 = vld [vmem:[#allocation7 + $0xd10] sm:$0xff]  ;;  %v1936_v63 = vpack.c.bf16 %v515_v56, %v511_v55  ;;  %v521_v2 = vld [vmem:[#allocation7 + $0xd68] sm:$0xff] }
 0x107   :  { %v514_v0 = vld [vmem:[#allocation7 + $0xd30] sm:$0xff]  ;;  %v1251_v52 = vld [vmem:[#allocation10 + $0x198] sm:$0xff] }
 0x108   :  { %1675 = vmatpush1.bf16.msra.mxu0 %v1674_v11  ;;  %v480_v11 = vld [vmem:[#allocation7 + $0xc20] sm:$0xff] }
 0x109   :  { %1899 = vmatpush1.bf16.msra.mxu1 %v1898_v12  ;;  %1677 = vmatprep.subr.bf16.mxu0 %v1676_v13  ;;  %v478_v12 = vld [vmem:[#allocation7 + $0xc10] sm:$0xff]  ;;  %v1920_v13 = vpack.c.bf16 %v483_v6, %v479_v5  ;;  %v1698_v20 = vpack.c.bf16 %v480_v11, %v476_v10  ;;  %v1938_v6 = vpack.c.bf16 %v514_v0, %v510_v62  ;;  %v1220_v62 = vld [vmem:[#allocation10 + $0xa0] sm:$0xff] }
 0x10a   :  { %1901 = vmatprep.subr.bf16.mxu1 %v1900_v17  ;;  %v487_v17 = vld [vmem:[#allocation7 + $0xc58] sm:$0xff]  ;;  %v1922_v21 = vpack.c.bf16 %v482_v14, %v478_v12  ;;  %v518_v10 = vld [vmem:[#allocation7 + $0xd50] sm:$0xff]  ;;  %v1940_v11 = vpack.c.bf16 %v523_v4, %v519_v3  ;;  %v529_v14 = vld [vmem:[#allocation7 + $0xda8] sm:$0xff] }
 0x10b   :  { %v1924_v26 = vpack.c.bf16 %v491_v18, %v487_v17  ;;  %v522_v12 = vld [vmem:[#allocation7 + $0xd70] sm:$0xff]  ;;  %v1252_v0 = vld [vmem:[#allocation10 + $0x1a0] sm:$0xff] }
 0x10c   :  { %1679 = vmatpush1.bf16.msra.mxu0 %v1678_v23  ;;  %v484_v23 = vld [vmem:[#allocation7 + $0xc40] sm:$0xff]  ;;  %v1942_v18 = vpack.c.bf16 %v522_v12, %v518_v10  ;;  %v1222_v10 = vld [vmem:[#allocation10 + $0xb0] sm:$0xff] }
 0x10d   :  { %1903 = vmatpush1.bf16.msra.mxu1 %v1902_v24  ;;  %1681 = vmatprep.subr.bf16.mxu0 %v1680_v25  ;;  %v488_v24 = vld [vmem:[#allocation7 + $0xc60] sm:$0xff]  ;;  %v486_v25 = vld [vmem:[#allocation7 + $0xc50] sm:$0xff] }
 0x10e   :  { %1905 = vmatprep.subr.bf16.mxu1 %v1904_v29  ;;  %v497_v29 = vld [vmem:[#allocation7 + $0xca8] sm:$0xff]  ;;  %v1702_v32 = vpack.c.bf16 %v488_v24, %v484_v23  ;;  %v1926_v33 = vpack.c.bf16 %v490_v27, %v486_v25  ;;  %v1944_v23 = vpack.c.bf16 %v531_v16, %v527_v15  ;;  %v530_v24 = vld [vmem:[#allocation7 + $0xdb0] sm:$0xff]  ;;  %v535_v27 = vld [vmem:[#allocation7 + $0xdd8] sm:$0xff] }
 0x10f   :  { %v1704_v34 = vpack.c.bf16 %v497_v29, %v493_v28  ;;  %v533_v25 = vld [vmem:[#allocation7 + $0xdc8] sm:$0xff]  ;;  %v539_v28 = vld [vmem:[#allocation7 + $0xdf8] sm:$0xff] }
 0x110   :  { %1683 = vmatpush1.bf16.msra.mxu0 %v1682_v35  ;;  %v492_v35 = vld [vmem:[#allocation7 + $0xc80] sm:$0xff]  ;;  %v1254_v12 = vld [vmem:[#allocation10 + $0x1b0] sm:$0xff] }
 0x111   :  { %1907 = vmatpush1.bf16.msra.mxu1 %v1906_v36  ;;  %1685 = vmatprep.subr.bf16.mxu0 %v1684_v37  ;;  %v496_v36 = vld [vmem:[#allocation7 + $0xca0] sm:$0xff]  ;;  %v494_v37 = vld [vmem:[#allocation7 + $0xc90] sm:$0xff] }
 0x112   :  { %1909 = vmatprep.subr.bf16.mxu1 %v1908_v41  ;;  %v505_v41 = vld [vmem:[#allocation7 + $0xce8] sm:$0xff]  ;;  %v1706_v45 = vpack.c.bf16 %v496_v36, %v492_v35  ;;  %v1930_v46 = vpack.c.bf16 %v498_v39, %v494_v37  ;;  %v1948_v35 = vpack.c.bf16 %v539_v28, %v535_v27  ;;  %v538_v36 = vld [vmem:[#allocation7 + $0xdf0] sm:$0xff] }
 0x113   :  { %v1216_v37 = vld [vmem:[#allocation10 + $0x80] sm:$0xff] }
 0x114   :  { %1687 = vmatpush1.bf16.msra.mxu0 %v1686_v47  ;;  %v1708_v47 = vpack.c.bf16 %v505_v41, %v501_v40  ;;  %v1248_v39 = vld [vmem:[#allocation10 + $0x180] sm:$0xff]  ;;  %v1249_v40 = vld [vmem:[#allocation10 + $0x188] sm:$0xff] }
 0x115   :  { %1911 = vmatpush1.bf16.msra.mxu1 %v1910_v48  ;;  %1689 = vmatprep.subr.bf16.mxu0 %v1688_v49  ;;  %v500_v48 = vld [vmem:[#allocation7 + $0xcc0] sm:$0xff] }
 0x116   :  { %1913 = vmatprep.subr.bf16.mxu1 %v1912_v53  ;;  %v504_v49 = vld [vmem:[#allocation7 + $0xce0] sm:$0xff]  ;;  %v509_v53 = vld [vmem:[#allocation7 + $0xd08] sm:$0xff] }
 0x117   :  { %v1710_v57 = vpack.c.bf16 %v504_v49, %v500_v48  ;;  %v1233_v48 = vld [vmem:[#allocation10 + $0x108] sm:$0xff]  ;;  %v1218_v49 = vld [vmem:[#allocation10 + $0x90] sm:$0xff] }
 0x118   :  { %1691 = vmatpush1.bf16.msra.mxu0 %v1690_v59  ;;  %v1712_v59 = vpack.c.bf16 %v513_v54, %v509_v53  ;;  %v91_v53 = vld [vmem:[#allocation4 + $0x30] sm:$0xff]  ;;  %v1956_v56 = vpack.c.bf16 %v1219_v50, %v1218_v49  ;;  %v1229_v49 = vld [vmem:[#allocation10 + $0xe8] sm:$0xff]  ;;  %v1260_v50 = vld [vmem:[#allocation10 + $0x1e0] sm:$0xff] }
 0x119   :  { %1915 = vmatpush1.bf16.msra.mxu1 %v1914_v60  ;;  %1693 = vmatprep.subr.bf16.mxu0 %v1692_v61  ;;  %v508_v60 = vld [vmem:[#allocation7 + $0xd00] sm:$0xff] }
 0x11a   :  { %1917 = vmatprep.subr.bf16.mxu1 %v1916_v1  ;;  %v512_v61 = vld [vmem:[#allocation7 + $0xd20] sm:$0xff]  ;;  %v517_v1 = vld [vmem:[#allocation7 + $0xd48] sm:$0xff] }
 0x11b   :  { %v1714_v5 = vpack.c.bf16 %v512_v61, %v508_v60  ;;  %v1235_v61 = vld [vmem:[#allocation10 + $0x118] sm:$0xff] }
 0x11c   :  { %1695 = vmatpush1.bf16.msra.mxu0 %v1694_v7  ;;  %v1716_v7 = vpack.c.bf16 %v521_v2, %v517_v1  ;;  %v1253_v1 = vld [vmem:[#allocation10 + $0x1a8] sm:$0xff] }
 0x11d   :  { %1919 = vmatpush1.bf16.msra.mxu1 %v1918_v8  ;;  %1697 = vmatprep.subr.bf16.mxu0 %v1696_v9  ;;  %v516_v8 = vld [vmem:[#allocation7 + $0xd40] sm:$0xff] }
 0x11e   :  { %1921 = vmatprep.subr.bf16.mxu1 %v1920_v13  ;;  %v520_v9 = vld [vmem:[#allocation7 + $0xd60] sm:$0xff]  ;;  %v525_v13 = vld [vmem:[#allocation7 + $0xd88] sm:$0xff] }
 0x11f   :  { %769 = vmatmul.mubr.f32.vlgmr.msra.gmra.mrb[0].mxu0 %v89_v19  ;;  %v1718_v17 = vpack.c.bf16 %v520_v9, %v516_v8  ;;  %v1992_v8 = vpack.c.bf16 %v1253_v1, %v1252_v0  ;;  %v1237_v9 = vld [vmem:[#allocation10 + $0x128] sm:$0xff]  ;;  %v1263_v0 = vld [vmem:[#allocation10 + $0x1f8] sm:$0xff]  ;;  %v1214_v1 = vld [vmem:[#allocation10 + $0x70] sm:$0xff] }
 0x120   :  { %1699 = vmatpush1.bf16.msra.mxu0 %v1698_v20  ;;  %1053 = vmatmul.mubr.f32.vlgmr.msra.gmra.mrb[0].mxu1 %v89_v19  ;;  %v1720_v19 = vpack.c.bf16 %v529_v14, %v525_v13  ;;  %v524_v20 = vld [vmem:[#allocation7 + $0xd80] sm:$0xff] }
 0x121   :  { %1923 = vmatpush1.bf16.msra.mxu1 %v1922_v21  ;;  %1701 = vmatprep.subr.bf16.mxu0 %v1700_v22  ;;  %v528_v21 = vld [vmem:[#allocation7 + $0xda0] sm:$0xff]  ;;  %v526_v22 = vld [vmem:[#allocation7 + $0xd90] sm:$0xff] }
 0x122   :  { %1925 = vmatprep.subr.bf16.mxu1 %v1924_v26  ;;  %839 = vmatprep.mubr.f32.mxu0 %v2192_v42  ;;  %v537_v26 = vld [vmem:[#allocation7 + $0xde8] sm:$0xff]  ;;  %v1722_v29 = vpack.c.bf16 %v528_v21, %v524_v20  ;;  %v1946_v30 = vpack.c.bf16 %v530_v24, %v526_v22  ;;  %v1255_v13 = vld [vmem:[#allocation10 + $0x1b8] sm:$0xff] }
 0x123   :  { %1123 = vmatprep.mubr.f32.mxu1 %v2192_v42  ;;  %v1724_v31 = vpack.c.bf16 %v537_v26, %v533_v25  ;;  %v1996_v20 = vpack.c.bf16 %v1255_v13, %v1254_v12  ;;  %v1239_v21 = vld [vmem:[#allocation10 + $0x138] sm:$0xff]  ;;  %v1224_v22 = vld [vmem:[#allocation10 + $0xc0] sm:$0xff]  ;;  %v1257_v25 = vld [vmem:[#allocation10 + $0x1c8] sm:$0xff] }
 0x124   :  { %1703 = vmatpush1.bf16.msra.mxu0 %v1702_v32  ;;  %v532_v32 = vld [vmem:[#allocation7 + $0xdc0] sm:$0xff] }
 0x125   :  { %1927 = vmatpush1.bf16.msra.mxu1 %v1926_v33  ;;  %1705 = vmatprep.subr.bf16.mxu0 %v1704_v34  ;;  %v536_v33 = vld [vmem:[#allocation7 + $0xde0] sm:$0xff]  ;;  %v534_v34 = vld [vmem:[#allocation7 + $0xdd0] sm:$0xff] }
 0x126   :  { %1929 = vmatprep.subr.bf16.mxu1 %v1928_v38  ;;  %v1217_v38 = vld [vmem:[#allocation10 + $0x88] sm:$0xff]  ;;  %v1726_v41 = vpack.c.bf16 %v536_v33, %v532_v32  ;;  %v1950_v42 = vpack.c.bf16 %v538_v36, %v534_v34  ;;  %v1256_v24 = vld [vmem:[#allocation10 + $0x1c0] sm:$0xff]  ;;  %v1226_v34 = vld [vmem:[#allocation10 + $0xd0] sm:$0xff] }
 0x127   :  { %v1952_v43 = vpack.c.bf16 %v1217_v38, %v1216_v37  ;;  %v2000_v32 = vpack.c.bf16 %v1257_v25, %v1256_v24  ;;  %v1241_v33 = vld [vmem:[#allocation10 + $0x148] sm:$0xff]  ;;  %v1258_v36 = vld [vmem:[#allocation10 + $0x1d0] sm:$0xff]  ;;  %v1259_v37 = vld [vmem:[#allocation10 + $0x1d8] sm:$0xff] }
 0x128   :  { %1707 = vmatpush1.bf16.msra.mxu0 %v1706_v45  ;;  %v1201_v45 = vld [vmem:[#allocation10 + $0x8] sm:$0xff] }
 0x129   :  { %1931 = vmatpush1.bf16.msra.mxu1 %v1930_v46  ;;  %1709 = vmatprep.subr.bf16.mxu0 %v1708_v47  ;;  %v1232_v46 = vld [vmem:[#allocation10 + $0x100] sm:$0xff]  ;;  %v1984_v47 = vpack.c.bf16 %v1249_v40, %v1248_v39  ;;  %v1954_v54 = vpack.c.bf16 %v1201_v45, %v1200_v44  ;;  %v1242_v44 = vld [vmem:[#allocation10 + $0x150] sm:$0xff]  ;;  %v1243_v45 = vld [vmem:[#allocation10 + $0x158] sm:$0xff] }
 0x12a   :  { %1933 = vmatprep.subr.bf16.mxu1 %v1932_v51  ;;  %v1250_v51 = vld [vmem:[#allocation10 + $0x190] sm:$0xff]  ;;  %v1986_v55 = vpack.c.bf16 %v1233_v48, %v1232_v46  ;;  %v1228_v48 = vld [vmem:[#allocation10 + $0xe0] sm:$0xff] }
 0x12b   :  { %v1988_v60 = vpack.c.bf16 %v1251_v52, %v1250_v51  ;;  %v1976_v51 = vpack.c.bf16 %v1229_v49, %v1228_v48  ;;  %v1261_v52 = vld [vmem:[#allocation10 + $0x1e8] sm:$0xff] }
 0x12c   :  { %1711 = vmatpush1.bf16.msra.mxu0 %v1710_v57  ;;  %v1202_v57 = vld [vmem:[#allocation10 + $0x10] sm:$0xff] }
 0x12d   :  { %1935 = vmatpush1.bf16.msra.mxu1 %v1934_v58  ;;  %1713 = vmatprep.subr.bf16.mxu0 %v1712_v59  ;;  %v1203_v58 = vld [vmem:[#allocation10 + $0x18] sm:$0xff]  ;;  %v1234_v59 = vld [vmem:[#allocation10 + $0x110] sm:$0xff] }
 0x12e   :  { %1937 = vmatprep.subr.bf16.mxu1 %v1936_v63  ;;  %v1221_v63 = vld [vmem:[#allocation10 + $0xa8] sm:$0xff]  ;;  %v1958_v2 = vpack.c.bf16 %v1203_v58, %v1202_v57  ;;  %v1990_v3 = vpack.c.bf16 %v1235_v61, %v1234_v59  ;;  %v1244_v57 = vld [vmem:[#allocation10 + $0x160] sm:$0xff]  ;;  %v1231_v61 = vld [vmem:[#allocation10 + $0xf8] sm:$0xff] }
 0x12f   :  { %v1960_v4 = vpack.c.bf16 %v1221_v63, %v1220_v62  ;;  %v1245_v58 = vld [vmem:[#allocation10 + $0x168] sm:$0xff]  ;;  %v1262_v62 = vld [vmem:[#allocation10 + $0x1f0] sm:$0xff] }
 0x130   :  { %1715 = vmatpush1.bf16.msra.mxu0 %v1714_v5  ;;  %v1204_v5 = vld [vmem:[#allocation10 + $0x20] sm:$0xff]  ;;  %v2010_v59 = vpack.c.bf16 %v1245_v58, %v1244_v57 }
 0x131   :  { %1939 = vmatpush1.bf16.msra.mxu1 %v1938_v6  ;;  %1717 = vmatprep.subr.bf16.mxu0 %v1716_v7  ;;  %v1205_v6 = vld [vmem:[#allocation10 + $0x28] sm:$0xff]  ;;  %v1236_v7 = vld [vmem:[#allocation10 + $0x120] sm:$0xff] }
 0x132   :  { %1941 = vmatprep.subr.bf16.mxu1 %v1940_v11  ;;  %v1223_v11 = vld [vmem:[#allocation10 + $0xb8] sm:$0xff]  ;;  %v1962_v14 = vpack.c.bf16 %v1205_v6, %v1204_v5  ;;  %v1994_v15 = vpack.c.bf16 %v1237_v9, %v1236_v7  ;;  %v1246_v5 = vld [vmem:[#allocation10 + $0x170] sm:$0xff] }
 0x133   :  { %v1964_v16 = vpack.c.bf16 %v1223_v11, %v1222_v10  ;;  %v1247_v6 = vld [vmem:[#allocation10 + $0x178] sm:$0xff] }
 0x134   :  { %1719 = vmatpush1.bf16.msra.mxu0 %v1718_v17  ;;  %v1206_v17 = vld [vmem:[#allocation10 + $0x30] sm:$0xff]  ;;  %v2014_v7 = vpack.c.bf16 %v1247_v6, %v1246_v5 }
 0x135   :  { %1943 = vmatpush1.bf16.msra.mxu1 %v1942_v18  ;;  %1721 = vmatprep.subr.bf16.mxu0 %v1720_v19  ;;  %v1207_v18 = vld [vmem:[#allocation10 + $0x38] sm:$0xff]  ;;  %v1238_v19 = vld [vmem:[#allocation10 + $0x130] sm:$0xff] }
 0x136   :  { %1945 = vmatprep.subr.bf16.mxu1 %v1944_v23  ;;  %v1225_v23 = vld [vmem:[#allocation10 + $0xc8] sm:$0xff]  ;;  %v1966_v26 = vpack.c.bf16 %v1207_v18, %v1206_v17  ;;  %v1998_v27 = vpack.c.bf16 %v1239_v21, %v1238_v19 }
 0x137   :  { %v1968_v28 = vpack.c.bf16 %v1225_v23, %v1224_v22 }
 0x138   :  { %1723 = vmatpush1.bf16.msra.mxu0 %v1722_v29  ;;  %v1208_v29 = vld [vmem:[#allocation10 + $0x40] sm:$0xff] }
 0x139   :  { %1947 = vmatpush1.bf16.msra.mxu1 %v1946_v30  ;;  %1725 = vmatprep.subr.bf16.mxu0 %v1724_v31  ;;  %v1209_v30 = vld [vmem:[#allocation10 + $0x48] sm:$0xff]  ;;  %v1240_v31 = vld [vmem:[#allocation10 + $0x140] sm:$0xff] }
 0x13a   :  { %1949 = vmatprep.subr.bf16.mxu1 %v1948_v35  ;;  %v1227_v35 = vld [vmem:[#allocation10 + $0xd8] sm:$0xff]  ;;  %v1970_v38 = vpack.c.bf16 %v1209_v30, %v1208_v29  ;;  %v2002_v39 = vpack.c.bf16 %v1241_v33, %v1240_v31 }
 0x13b   :  { %v1972_v40 = vpack.c.bf16 %v1227_v35, %v1226_v34 }
 0x13c   :  { %1727 = vmatpush1.bf16.msra.mxu0 %v1726_v41  ;;  %v1210_v41 = vld [vmem:[#allocation10 + $0x50] sm:$0xff] }
 0x13d   :  { %1951 = vmatpush1.bf16.msra.mxu1 %v1950_v42  ;;  %1953 = vmatprep.subr.bf16.mxu0 %v1952_v43  ;;  %v1211_v42 = vld [vmem:[#allocation10 + $0x58] sm:$0xff]  ;;  %v2004_v43 = vpack.c.bf16 %v1259_v37, %v1258_v36 }
 0x13e   :  { %1985 = vmatprep.subr.bf16.mxu1 %v1984_v47  ;;  %v1974_v46 = vpack.c.bf16 %v1211_v42, %v1210_v41  ;;  %v2006_v47 = vpack.c.bf16 %v1243_v45, %v1242_v44  ;;  %v540_v44 = vld [vmem:[#allocation9] sm:$0xf] }
 0x13f   :  { %840 = vmatmul.mubr.f32.vlgmr.msra.gmra.mrb[0].mxu0 %v91_v53 }
 0x140   :  { %1124 = vmatmul.mubr.f32.vlgmr.msra.gmra.mrb[0].mxu1 %v91_v53  ;;  %1955 = vmatpush3.bf16.msra.mxu0 %v1954_v54  ;;  %v1212_v53 = vld [vmem:[#allocation10 + $0x60] sm:$0xff]  ;;  %v1213_v54 = vld [vmem:[#allocation10 + $0x68] sm:$0xff] }
 0x141   :  { %1987 = vmatpush3.bf16.msra.mxu1 %v1986_v55  ;;  %1957 = vmatprep.subr.bf16.mxu0 %v1956_v56  ;;  %v2008_v55 = vpack.c.bf16 %v1261_v52, %v1260_v50  ;;  %v1978_v56 = vpack.c.bf16 %v1213_v54, %v1212_v53 }
 0x142   :  { %1989 = vmatprep.subr.bf16.mxu1 %v1988_v60  ;;  %v1230_v60 = vld [vmem:[#allocation10 + $0xf0] sm:$0xff] }
 0x143   :  { %v1980_v63 = vpack.c.bf16 %v1231_v61, %v1230_v60 }
 0x144   :  { %1959 = vmatpush3.bf16.msra.mxu0 %v1958_v2  ;;  %v1215_v2 = vld [vmem:[#allocation10 + $0x78] sm:$0xff] }
 0x145   :  { %1991 = vmatpush3.bf16.msra.mxu1 %v1990_v3  ;;  %1961 = vmatprep.subr.bf16.mxu0 %v1960_v4  ;;  %v2012_v3 = vpack.c.bf16 %v1263_v0, %v1262_v62  ;;  %v1982_v4 = vpack.c.bf16 %v1215_v2, %v1214_v1 }
 0x146   :  { %1993 = vmatprep.subr.bf16.mxu1 %v1992_v8  ;;  %v542_v8 = vlaneseq }
 0x148   :  { %1963 = vmatpush3.bf16.msra.mxu0 %v1962_v14  ;;  %v543_v9 = vshrl.u32 %v542_v8, 7  ;;  %v1140_v10 = vand.u32 127, %v542_v8 }
 0x149   :  { %1995 = vmatpush3.bf16.msra.mxu1 %v1994_v15  ;;  %1965 = vmatprep.subr.bf16.mxu0 %v1964_v16  ;;  %v1151_v16 = vstv %s1150_s10 }
 0x14a   :  { %1997 = vmatprep.subr.bf16.mxu1 %v1996_v20  ;;  %v1141_v11 = vadd.s32 128, %v1140_v10  ;;  %v1144_v12 = vmul.u32 512, %v543_v9  ;;  %v1143_v13 = vadd.s32 384, %v1140_v10  ;;  %v1142_v14 = vadd.s32 256, %v1140_v10 }
 0x14b   :  { %v544_v45 = vsub.s32 0, %v543_v9  ;;  %v548_v48 = vsub.s32 1, %v543_v9 }
 0x14c   :  { %1967 = vmatpush3.bf16.msra.mxu0 %v1966_v26  ;;  %v1146_v15 = vadd.s32 %v1144_v12, %v1141_v11  ;;  %v1148_v17 = vadd.s32 %v1144_v12, %v1143_v13  ;;  %v1145_v18 = vadd.s32 %v1144_v12, %v1140_v10  ;;  %v1147_v19 = vadd.s32 %v1144_v12, %v1142_v14 }
 0x14d   :  { %1999 = vmatpush3.bf16.msra.mxu1 %v1998_v27  ;;  %1969 = vmatprep.subr.bf16.mxu0 %v1968_v28  ;;  %v545_v53 = vrot.slane %v540_v44, %v544_v45 }
 0x14e   :  { %2001 = vmatprep.subr.bf16.mxu1 %v2000_v32  ;;  %v1153_v20 = vxor.u32 %v1151_v16, %v1146_v15  ;;  %v1155_v21 = vxor.u32 %v1151_v16, %v1148_v17  ;;  %v1152_v22 = vxor.u32 %v1151_v16, %v1145_v18  ;;  %v1154_v23 = vxor.u32 %v1151_v16, %v1147_v19  ;;  %v1429_v19 = vld [vmem:[#allocation12] ss:$0 sm:$0xff] }
 0x150   :  { %1971 = vmatpush3.bf16.msra.mxu0 %v1970_v38  ;;  %v1157_v24 = vshrl.u32 %v1153_v20, 16  ;;  %v1159_v25 = vshrl.u32 %v1155_v21, 16  ;;  %v1156_v26 = vshrl.u32 %v1152_v22, 16  ;;  %v1158_v27 = vshrl.u32 %v1154_v23, 16 }
 0x151   :  { %2003 = vmatpush3.bf16.msra.mxu1 %v2002_v39  ;;  %1973 = vmatprep.subr.bf16.mxu0 %v1972_v40 }
 0x152   :  { %2005 = vmatprep.subr.bf16.mxu1 %v2004_v43  ;;  %v1161_v28 = vxor.u32 %v1157_v24, %v1153_v20  ;;  %v1163_v29 = vxor.u32 %v1159_v25, %v1155_v21  ;;  %v1160_v30 = vxor.u32 %v1156_v26, %v1152_v22  ;;  %v1162_v31 = vxor.u32 %v1158_v27, %v1154_v23 }
 0x154   :  { %1975 = vmatpush3.bf16.msra.mxu0 %v1974_v46  ;;  %v1165_v32 = vmul.u32 2246822507, %v1161_v28  ;;  %v1167_v33 = vmul.u32 2246822507, %v1163_v29 }
 0x155   :  { %2007 = vmatpush3.bf16.msra.mxu1 %v2006_v47  ;;  %1977 = vmatprep.subr.bf16.mxu0 %v1976_v51  ;;  %v1164_v34 = vmul.u32 2246822507, %v1160_v30  ;;  %v1166_v35 = vmul.u32 2246822507, %v1162_v31  ;;  %v552_v47 = vsub.s32 2, %v543_v9  ;;  %v556_v51 = vsub.s32 3, %v543_v9 }
 0x156   :  { %2009 = vmatprep.subr.bf16.mxu1 %v2008_v55  ;;  %v1169_v36 = vshrl.u32 %v1165_v32, 13  ;;  %v1171_v37 = vshrl.u32 %v1167_v33, 13 }
 0x157   :  { %v1168_v38 = vshrl.u32 %v1164_v34, 13  ;;  %v1170_v39 = vshrl.u32 %v1166_v35, 13  ;;  %v553_v55 = vrot.slane %v540_v44, %v552_v47 }
 0x158   :  { %1979 = vmatpush3.bf16.msra.mxu0 %v1978_v56  ;;  %v1173_v40 = vxor.u32 %v1169_v36, %v1165_v32  ;;  %v1175_v41 = vxor.u32 %v1171_v37, %v1167_v33  ;;  %v549_v56 = vrot.slane %v540_v44, %v548_v48 }
 0x159   :  { %2011 = vmatpush3.bf16.msra.mxu1 %v2010_v59  ;;  %1981 = vmatprep.subr.bf16.mxu0 %v1980_v63  ;;  %v1172_v42 = vxor.u32 %v1168_v38, %v1164_v34  ;;  %v1174_v43 = vxor.u32 %v1170_v39, %v1166_v35  ;;  %v557_v59 = vrot.slane %v540_v44, %v556_v51 }
 0x15a   :  { %2013 = vmatprep.subr.bf16.mxu1 %v2012_v3  ;;  %v1177_v46 = vmul.u32 3266489909, %v1173_v40  ;;  %v1179_v49 = vmul.u32 3266489909, %v1175_v41 }
 0x15b   :  { %v1176_v50 = vmul.u32 3266489909, %v1172_v42  ;;  %v1178_v52 = vmul.u32 3266489909, %v1174_v43 }
 0x15c   :  { %1983 = vmatpush3.bf16.msra.mxu0 %v1982_v4  ;;  %v1181_v54 = vshrl.u32 %v1177_v46, 16  ;;  %v1183_v57 = vshrl.u32 %v1179_v49, 16 }
 0x15d   :  { %2015 = vmatpush3.bf16.msra.mxu1 %v2014_v7  ;;  %v1180_v58 = vshrl.u32 %v1176_v50, 16  ;;  %v1182_v60 = vshrl.u32 %v1178_v52, 16 }
 0x15e   :  { %v1185_v1 = vxor.u32 %v1181_v54, %v1177_v46  ;;  %v1187_v5 = vxor.u32 %v1183_v57, %v1179_v49 }
 0x15f   :  { %v1184_v6 = vxor.u32 %v1180_v58, %v1176_v50  ;;  %v1186_v9 = vxor.u32 %v1182_v60, %v1178_v52 }
 0x160   :  { %vm1189_vm0 = vcmp.ge.u32.totalorder %v1185_v1, 858993459  ;;  %vm1191_vm1 = vcmp.ge.u32.totalorder %v1187_v5, 858993459 }
 0x161   :  { %vm1188_vm2 = vcmp.ge.u32.totalorder %v1184_v6, 858993459  ;;  %vm1190_vm3 = vcmp.ge.u32.totalorder %v1186_v9, 858993459 }
 0x212   :  { %v841_v61 = vpop.f32.mrb[0].mxu0 }
 0x213   :  { %v2016_v62 = vadd.f32 %v841_v61, %v545_v53  ;;  %v1125_v63 = vpop.f32.mrb[0].mxu1  ;;  %v843_v0 = vpop.f32.mrb[1].mxu0 }
 0x214   :  { %v2018_v2 = vadd.f32 %v1125_v63, %v553_v55  ;;  %v2017_v3 = vadd.f32 %v843_v0, %v549_v56  ;;  %v1127_v4 = vpop.f32.mrb[1].mxu1 }
 0x215   :  { %v1130_v7 = vmax.f32 %v2016_v62, 0.0  ;;  %v2019_v8 = vadd.f32 %v1127_v4, %v557_v59 }
 0x216   :  { %v1132_v10 = vmax.f32 %v2018_v2, 0.0  ;;  %v1131_v11 = vmax.f32 %v2017_v3, 0.0 }
 0x217   :  { %v1133_v12 = vmax.f32 %v2019_v8, 0.0  ;;  %v1192_v14 = vmul.f32 1.25, %v1130_v7 }
 0x218   :  { %v1193_v13 = vmul.f32 1.25, %v1131_v11  ;;  %v1194_v16 = vmul.f32 1.25, %v1132_v10 }
 0x219   :  { %v1195_v15 = vmul.f32 1.25, %v1133_v12 }
 0x21a   :  { %1430 = vmatprep.mubr.msk.f32.mxu0 %vm1189_vm0, %v1193_v13 }
 0x21b   :  { %1432 = vmatprep.mubr.msk.f32.mxu1 %vm1191_vm1, %v1195_v15  ;;  %1431 = vmatmul.mubr.msk.f32.vlgmr.msra.gmra.mrb[2].mxu0 %vm1188_vm2, %v1192_v14 }
 0x21c   :  { %1433 = vmatmul.mubr.msk.f32.vlgmr.msra.gmra.mrb[2].mxu1 %vm1190_vm3, %v1194_v16 }
 0x2ee   :  { %v1466_v17 = vpop.f32.mrb[2].mxu0 }
 0x2ef   :  { %v1501_v18 = vpop.f32.mrb[2].mxu1  ;;  %v1467_v20 = vpop.f32.mrb[3].mxu0 }
 0x2f0   :  { %v1468_v21 = vadd.f32 %v1467_v20, %v1466_v17  ;;  %v1502_v22 = vpop.f32.mrb[3].mxu1 }
 0x2f1   :  { %v1503_v23 = vadd.f32 %v1502_v22, %v1501_v18 }
 0x2f2   :  { %v1338_v24 = vadd.f32 %v1468_v21, %v1429_v19 }
 0x2f4   :  { %v1408_v25 = vadd.f32 %v1503_v23, %v1338_v24 }
 0x2f6   :  { %1411 = vst [vmem:[#allocation13] sm:$0xff] %v1408_v25 }
 0x2f7   :  { %2164 = shalt.err (!%p2161_p2)
}
 0x2f8   :  { %s2165_s14 = scalar_lea.hbm %s2310_s6, 128 }
 0x2f9   :  { %p2166_p3 = scmp.ne.s32.totalorder %s2310_s6, %s2165_s14  ;;  %p2169_p4 = scmp.lt.u32.totalorder %s2165_s14, %s2310_s6 }
 0x2fb   :  { %p2171_p5 = pnand %p2169_p4, %p2166_p3 }
 0x2fd   :  { %2174 = shalt.err (!%p2171_p5)
}
 0x2fe   :  { %1421 = dma.vmem_to_hbm [thread:$0]  %s1419_s4, 128, %s2310_s6, [#allocation6]  }
 0x2ff   :  { %2181 = dma.done.wait [#allocation6], 128  }
 0x300   :  { %2182 = vsyncadd [#allocation6], 4294967168 }
 0x301   :  { %1425 = vsyncpa [#allocation5], 1 }
 0x302   :  { %1426 = vsyncpa [#allocation8], 1 }
 0x303   :  { %1427 = vsyncpa [#allocation11], 1 }
 0x304   :  { %1428 = vsyncpa [#allocation6], 1 }

</bundles_post_ra>
